<compile_context>
chip_gen: v7x
topology: tpu7x:2x2x1
jax: 0.10.0
libtpu: 0.0.40
codegen_flags: <defaults>
</compile_context>

<pallas_src>
import functools
import math

import jax
import jax.numpy as jnp
import numpy as np
from jax.experimental import pallas as pl
from jax.experimental.pallas import tpu as pltpu


def _round_up(a, b):
    return -(-a // b) * b


# ----------------------------- kernels ---------------------------------------

def _stats_kernel(xe_ref, xo_ref, w1_ref, w2_ref, stats_ref):
    """Per-block partial BN statistics of the conv outputs (recomputed again in pass 2).

    xe/xo blocks are packed (tm, r*C_in); w1/w2 are block-diagonal (r*C_in, r*C_half),
    so y1/y2 come out lane-dense as (tm, r*C_half)."""
    y1 = jnp.dot(xe_ref[...], w1_ref[...], preferred_element_type=jnp.float32)
    y2 = jnp.dot(xo_ref[...], w2_ref[...], preferred_element_type=jnp.float32)
    s1 = jnp.sum(y1, axis=0, keepdims=True)
    q1 = jnp.sum(y1 * y1, axis=0, keepdims=True)
    s2 = jnp.sum(y2, axis=0, keepdims=True)
    q2 = jnp.sum(y2 * y2, axis=0, keepdims=True)
    top = jnp.concatenate([s1, q1, s2, q2], axis=0)                # (4, Kp)
    stats_ref[...] = jnp.concatenate([top, jnp.zeros_like(top)], axis=0)[None]


def _conv_bn_relu_kernel(xe_ref, xo_ref, w1_ref, w2_ref, sh1_ref, sh2_ref, o1_ref, o2_ref):
    """Fused 1x1x1 strided conv (BN scale pre-folded into weights) + shift + ReLU."""
    y1 = jnp.dot(xe_ref[...], w1_ref[...], preferred_element_type=jnp.float32)
    o1_ref[...] = jnp.maximum(y1 + sh1_ref[...], 0.0)
    y2 = jnp.dot(xo_ref[...], w2_ref[...], preferred_element_type=jnp.float32)
    o2_ref[...] = jnp.maximum(y2 + sh2_ref[...], 0.0)


# ----------------------------- wrapper ----------------------------------------

@functools.partial(jax.jit, static_argnames=("eps",))
def factorized_reduce(x, w1, w2, gamma, beta, *, eps=1e-5):
    """x: (N, C_in, D, H, W) f32; w1/w2: (C_half, C_in, 1, 1, 1); gamma/beta: (C_out,)."""
    x = x.astype(jnp.float32)
    N, C_in, D, H, W = x.shape
    C_half = w1.shape[0]
    assert D % 2 == 0 and H % 2 == 0 and W % 2 == 0, "even spatial dims required for the concat"
    Do, Ho, Wo = D // 2, H // 2, W // 2
    M = N * Do * Ho * Wo

    # --- glue: stride-2 subsample + channels-last flatten ------------------------------
    # conv(k=1, stride=2) on x          <->  x[..., ::2, ::2, ::2]
    # conv(k=1, stride=2) on x[:,:,1:,1:,1:] <-> x[..., 1::2, 1::2, 1::2]
    # TODO(synk): fuse this NCDHW subsample/transpose (and the final NCDHW transpose)
    # into the Pallas passes to drop the remaining XLA layout round-trips.
    xe = jnp.transpose(x[:, :, ::2, ::2, ::2], (0, 2, 3, 4, 1)).reshape(M, C_in)
    xo = jnp.transpose(x[:, :, 1::2, 1::2, 1::2], (0, 2, 3, 4, 1)).reshape(M, C_in)

    # Pack r rows per packed row so both the input width and the per-stream conv output
    # width are multiples of 128 lanes (test sizes: r=32 -> widths 128 / 128).
    r1 = 128 // math.gcd(128, C_in)
    r2 = 128 // math.gcd(128, C_half)
    r = r1 * r2 // math.gcd(r1, r2)
    Win = r * C_in             # packed input width
    Kp = r * C_half            # packed per-stream output width

    rows = _round_up(M, r) // r
    # tile rows from a VMEM budget: ~2x (double buffering) * tm * row_bytes live per step
    row_bytes = 4 * (2 * Win + 2 * Kp)                 # pass-2 per-packed-row traffic (f32)
    vmem_budget = 24 * 1024 * 1024                     # fits v7x's smaller VMEM w/ headroom
    tm = max(8, min(vmem_budget // (2 * row_bytes), 8192)) // 8 * 8
    tm = min(tm, _round_up(rows, 8))
    grid = _round_up(rows, tm) // tm
    rows_total = grid * tm

    def pack(a):  # (M, C) -> (rows_total, r*C); zero rows contribute 0 to all statistics
        c = a.shape[1]
        a = jnp.pad(a, ((0, rows_total * r - M), (0, 0)))
        return a.reshape(rows_total, r * c)

    xe_p = pack(xe)
    xo_p = pack(xo)

    w1_m = w1.reshape(C_half, C_in).T.astype(jnp.float32)        # (C_in, C_half)
    w2_m = w2.reshape(C_half, C_in).T.astype(jnp.float32)
    eye_r = jnp.eye(r, dtype=jnp.float32)
    w1_bd = jnp.kron(eye_r, w1_m)                                # (Win, Kp) block-diagonal
    w2_bd = jnp.kron(eye_r, w2_m)

    cparams = pltpu.CompilerParams(
        dimension_semantics=("parallel",),     # per-block partial stats -> megacore-safe
        vmem_limit_bytes=48 * 1024 * 1024,
    )

    # --- pass 1: per-block partial channel sums / sums of squares ----------------------
    stats = pl.pallas_call(
        _stats_kernel,
        out_shape=jax.ShapeDtypeStruct((grid, 8, Kp), jnp.float32),
        grid_spec=pltpu.PrefetchScalarGridSpec(
            num_scalar_prefetch=0,
            grid=(grid,),
            in_specs=[
                pl.BlockSpec((tm, Win), lambda i: (i, 0)),
                pl.BlockSpec((tm, Win), lambda i: (i, 0)),
                pl.BlockSpec((Win, Kp), lambda i: (0, 0)),
                pl.BlockSpec((Win, Kp), lambda i: (0, 0)),
            ],
            out_specs=pl.BlockSpec((1, 8, Kp), lambda i: (i, 0, 0)),
        ),
        compiler_params=cparams,
    )(xe_p, xo_p, w1_bd, w2_bd)

    # --- tiny scalar glue: reduce partials, build BN scale/shift, fold scale into W ----
    tot = jnp.sum(stats, axis=0)                                  # (8, Kp)
    s1 = jnp.sum(tot[0].reshape(r, C_half), axis=0)
    q1 = jnp.sum(tot[1].reshape(r, C_half), axis=0)
    s2 = jnp.sum(tot[2].reshape(r, C_half), axis=0)
    q2 = jnp.sum(tot[3].reshape(r, C_half), axis=0)
    inv_m = 1.0 / float(M)
    mean1, mean2 = s1 * inv_m, s2 * inv_m
    var1 = jnp.maximum(q1 * inv_m - mean1 * mean1, 0.0)           # clamp: no NaN from rounding
    var2 = jnp.maximum(q2 * inv_m - mean2 * mean2, 0.0)
    g1, g2 = gamma[:C_half].astype(jnp.float32), gamma[C_half:].astype(jnp.float32)
    b1, b2 = beta[:C_half].astype(jnp.float32), beta[C_half:].astype(jnp.float32)
    scale1 = g1 / jnp.sqrt(var1 + eps)
    scale2 = g2 / jnp.sqrt(var2 + eps)
    shift1 = b1 - mean1 * scale1
    shift2 = b2 - mean2 * scale2

    w1_s = w1_bd * jnp.tile(scale1, r)[None, :]                   # fold BN scale into weights
    w2_s = w2_bd * jnp.tile(scale2, r)[None, :]
    sh1 = jnp.tile(shift1, r).reshape(1, Kp)
    sh2 = jnp.tile(shift2, r).reshape(1, Kp)

    # --- pass 2: recompute conv with folded scale, add shift, ReLU (lane-dense stores) -
    o1, o2 = pl.pallas_call(
        _conv_bn_relu_kernel,
        out_shape=(
            jax.ShapeDtypeStruct((rows_total, Kp), jnp.float32),
            jax.ShapeDtypeStruct((rows_total, Kp), jnp.float32),
        ),
        grid_spec=pltpu.PrefetchScalarGridSpec(
            num_scalar_prefetch=0,
            grid=(grid,),
            in_specs=[
                pl.BlockSpec((tm, Win), lambda i: (i, 0)),
                pl.BlockSpec((tm, Win), lambda i: (i, 0)),
                pl.BlockSpec((Win, Kp), lambda i: (0, 0)),
                pl.BlockSpec((Win, Kp), lambda i: (0, 0)),
                pl.BlockSpec((1, Kp), lambda i: (0, 0)),
                pl.BlockSpec((1, Kp), lambda i: (0, 0)),
            ],
            out_specs=[
                pl.BlockSpec((tm, Kp), lambda i: (i, 0)),
                pl.BlockSpec((tm, Kp), lambda i: (i, 0)),
            ],
        ),
        compiler_params=cparams,
    )(xe_p, xo_p, w1_s, w2_s, sh1, sh2)

    # --- glue: unpack to NCDHW and channel-concat (conv_1 | conv_2) --------------------
    def unpack(o):
        y = o.reshape(rows_total * r, C_half)[:M]
        return jnp.transpose(y.reshape(N, Do, Ho, Wo, C_half), (0, 4, 1, 2, 3))

    return jnp.concatenate([unpack(o1), unpack(o2)], axis=1)


# ----------------------------- reference (pure JAX) ----------------------------

def _reference(x, w1, w2, gamma, beta, eps=1e-5):
    C_half = w1.shape[0]
    xe = x[:, :, ::2, ::2, ::2]
    xo = x[:, :, 1::2, 1::2, 1::2]
    y1 = jnp.einsum("ncdhw,kc->nkdhw", xe, w1.reshape(C_half, -1))
    y2 = jnp.einsum("ncdhw,kc->nkdhw", xo, w2.reshape(C_half, -1))
    y = jnp.concatenate([y1, y2], axis=1)
    mean = y.mean(axis=(0, 2, 3, 4), keepdims=True)
    var = y.var(axis=(0, 2, 3, 4), keepdims=True)
    g = gamma.reshape(1, -1, 1, 1, 1)
    b = beta.reshape(1, -1, 1, 1, 1)
    return jnp.maximum((y - mean) / jnp.sqrt(var + eps) * g + b, 0.0)


# ----------------------------- main --------------------------------------------

if __name__ == "__main__":
    N, C_in, C_out = 2, 4, 8
    D = H = W = 16
    C_half = C_out // 2

    key = jax.random.PRNGKey(0)
    kx, k1, k2 = jax.random.split(key, 3)

    x = jax.random.normal(kx, (N, C_in, D, H, W), dtype=jnp.float32)

    # kaiming_normal_(mode='fan_out', nonlinearity='relu'): std = sqrt(2 / (C_half * 1*1*1))
    std = float(np.sqrt(2.0 / C_half))
    w1 = std * jax.random.normal(k1, (C_half, C_in, 1, 1, 1), dtype=jnp.float32)
    w2 = std * jax.random.normal(k2, (C_half, C_in, 1, 1, 1), dtype=jnp.float32)
    gamma = jnp.ones((C_out,), dtype=jnp.float32)   # BN weight = 1
    beta = jnp.zeros((C_out,), dtype=jnp.float32)   # BN bias = 0

    out = factorized_reduce(x, w1, w2, gamma, beta)
    out = jax.block_until_ready(out)

    ref = _reference(x, w1, w2, gamma, beta)
    np.testing.assert_allclose(np.asarray(out), np.asarray(ref), rtol=2e-5, atol=2e-5)

    print("KERNEL_OK")
</pallas_src>

<mosaic_0001>
module attributes {stable_mosaic.version = 11 : i64} {
  func.func @_stats_kernel(%arg0: i32, %arg1: memref<32x128xf32, #tpu.memory_space<vmem>>, %arg2: memref<32x128xf32, #tpu.memory_space<vmem>>, %arg3: memref<128x128xf32, #tpu.memory_space<vmem>>, %arg4: memref<128x128xf32, #tpu.memory_space<vmem>>, %arg5: memref<1x8x128xf32, #tpu.memory_space<vmem>>) attributes {dimension_semantics = [#tpu.dimension_semantics<parallel>], iteration_bounds = array<i64: 1>, scalar_prefetch = 0 : i64, scratch_operands = 0 : i64, tpu.core_type = #tpu.core_type<tc>, window_params = [{transform_indices = @transform_0, window_bounds = array<i64: 32, 128>}, {transform_indices = @transform_1, window_bounds = array<i64: 32, 128>}, {pipeline_mode = #tpu.pipeline_mode<synchronous>, transform_indices = @transform_2, window_bounds = array<i64: 128, 128>}, {pipeline_mode = #tpu.pipeline_mode<synchronous>, transform_indices = @transform_3, window_bounds = array<i64: 128, 128>}, {transform_indices = @transform_4, window_bounds = array<i64: 1, 8, 128>}]} {
    %c0 = arith.constant 0 : index
    %c0_0 = arith.constant 0 : index
    %0 = vector.load %arg1[%c0, %c0_0] : memref<32x128xf32, #tpu.memory_space<vmem>>, vector<32x128xf32>
    %c0_1 = arith.constant 0 : index
    %c0_2 = arith.constant 0 : index
    %1 = vector.load %arg3[%c0_1, %c0_2] : memref<128x128xf32, #tpu.memory_space<vmem>>, vector<128x128xf32>
    %cst = arith.constant dense<0.000000e+00> : vector<32x128xf32>
    %2 = tpu.matmul %0, %1, %cst {dimension_numbers = #tpu.dot_dimension_numbers<[1], [0], [0], [1], [0, 0, 1, 1], [], []>} : vector<32x128xf32>, vector<128x128xf32>, vector<32x128xf32> -> vector<32x128xf32>
    %c0_3 = arith.constant 0 : index
    %c0_4 = arith.constant 0 : index
    %3 = vector.load %arg2[%c0_3, %c0_4] : memref<32x128xf32, #tpu.memory_space<vmem>>, vector<32x128xf32>
    %c0_5 = arith.constant 0 : index
    %c0_6 = arith.constant 0 : index
    %4 = vector.load %arg4[%c0_5, %c0_6] : memref<128x128xf32, #tpu.memory_space<vmem>>, vector<128x128xf32>
    %cst_7 = arith.constant dense<0.000000e+00> : vector<32x128xf32>
    %5 = tpu.matmul %3, %4, %cst_7 {dimension_numbers = #tpu.dot_dimension_numbers<[1], [0], [0], [1], [0, 0, 1, 1], [], []>} : vector<32x128xf32>, vector<128x128xf32>, vector<32x128xf32> -> vector<32x128xf32>
    %cst_8 = arith.constant dense<0.000000e+00> : vector<128xf32>
    %6 = vector.multi_reduction <add>, %2, %cst_8 [0] : vector<32x128xf32> to vector<128xf32>
    %7 = vector.shape_cast %6 : vector<128xf32> to vector<1x128xf32>
    %8 = arith.mulf %2, %2 : vector<32x128xf32>
    %cst_9 = arith.constant dense<0.000000e+00> : vector<128xf32>
    %9 = vector.multi_reduction <add>, %8, %cst_9 [0] : vector<32x128xf32> to vector<128xf32>
    %10 = vector.shape_cast %9 : vector<128xf32> to vector<1x128xf32>
    %cst_10 = arith.constant dense<0.000000e+00> : vector<128xf32>
    %11 = vector.multi_reduction <add>, %5, %cst_10 [0] : vector<32x128xf32> to vector<128xf32>
    %12 = vector.shape_cast %11 : vector<128xf32> to vector<1x128xf32>
    %13 = arith.mulf %5, %5 : vector<32x128xf32>
    %cst_11 = arith.constant dense<0.000000e+00> : vector<128xf32>
    %14 = vector.multi_reduction <add>, %13, %cst_11 [0] : vector<32x128xf32> to vector<128xf32>
    %15 = vector.shape_cast %14 : vector<128xf32> to vector<1x128xf32>
    %16 = tpu.concatenate %7, %10, %12, %15 in 0 : vector<1x128xf32>, vector<1x128xf32>, vector<1x128xf32>, vector<1x128xf32> -> vector<4x128xf32>
    %cst_12 = arith.constant 0.000000e+00 : f32
    %17 = vector.broadcast %cst_12 : f32 to vector<4x128xf32>
    %18 = tpu.concatenate %16, %17 in 0 : vector<4x128xf32>, vector<4x128xf32> -> vector<8x128xf32>
    %19 = vector.shape_cast %18 : vector<8x128xf32> to vector<1x8x128xf32>
    %c0_13 = arith.constant 0 : index
    %c0_14 = arith.constant 0 : index
    %c0_15 = arith.constant 0 : index
    %20 = vector.load %arg5[%c0_13, %c0_14, %c0_15] : memref<1x8x128xf32, #tpu.memory_space<vmem>>, vector<1x8x128xf32>
    tpu.vector_store %arg5[%c0_13, %c0_14, %c0_15], %19 {strides = array<i32>} : memref<1x8x128xf32, #tpu.memory_space<vmem>>, vector<1x8x128xf32>,
    return
  }
  func.func @transform_0(%arg0: i32) -> (i32, i32) {
    %c0_i32 = arith.constant 0 : i32
    %c0_i32_0 = arith.constant 0 : i32
    return %arg0, %c0_i32 : i32, i32
  }
  func.func @transform_1(%arg0: i32) -> (i32, i32) {
    %c0_i32 = arith.constant 0 : i32
    %c0_i32_0 = arith.constant 0 : i32
    return %arg0, %c0_i32 : i32, i32
  }
  func.func @transform_2(%arg0: i32) -> (i32, i32) {
    %c0_i32 = arith.constant 0 : i32
    %c0_i32_0 = arith.constant 0 : i32
    %c0_i32_1 = arith.constant 0 : i32
    return %c0_i32, %c0_i32_0 : i32, i32
  }
  func.func @transform_3(%arg0: i32) -> (i32, i32) {
    %c0_i32 = arith.constant 0 : i32
    %c0_i32_0 = arith.constant 0 : i32
    %c0_i32_1 = arith.constant 0 : i32
    return %c0_i32, %c0_i32_0 : i32, i32
  }
  func.func @transform_4(%arg0: i32) -> (i32, i32, i32) {
    %c0_i32 = arith.constant 0 : i32
    %c0_i32_0 = arith.constant 0 : i32
    %c0_i32_1 = arith.constant 0 : i32
    return %arg0, %c0_i32, %c0_i32_0 : i32, i32, i32
  }
}

module attributes {stable_mosaic.version = 11 : i64} {
  func.func @_conv_bn_relu_kernel(%arg0: i32, %arg1: memref<32x128xf32, #tpu.memory_space<vmem>>, %arg2: memref<32x128xf32, #tpu.memory_space<vmem>>, %arg3: memref<128x128xf32, #tpu.memory_space<vmem>>, %arg4: memref<128x128xf32, #tpu.memory_space<vmem>>, %arg5: memref<1x128xf32, #tpu.memory_space<vmem>>, %arg6: memref<1x128xf32, #tpu.memory_space<vmem>>, %arg7: memref<32x128xf32, #tpu.memory_space<vmem>>, %arg8: memref<32x128xf32, #tpu.memory_space<vmem>>) attributes {dimension_semantics = [#tpu.dimension_semantics<parallel>], iteration_bounds = array<i64: 1>, scalar_prefetch = 0 : i64, scratch_operands = 0 : i64, tpu.core_type = #tpu.core_type<tc>, window_params = [{transform_indices = @transform_0, window_bounds = array<i64: 32, 128>}, {transform_indices = @transform_1, window_bounds = array<i64: 32, 128>}, {pipeline_mode = #tpu.pipeline_mode<synchronous>, transform_indices = @transform_2, window_bounds = array<i64: 128, 128>}, {pipeline_mode = #tpu.pipeline_mode<synchronous>, transform_indices = @transform_3, window_bounds = array<i64: 128, 128>}, {pipeline_mode = #tpu.pipeline_mode<synchronous>, transform_indices = @transform_4, window_bounds = array<i64: 1, 128>}, {pipeline_mode = #tpu.pipeline_mode<synchronous>, transform_indices = @transform_5, window_bounds = array<i64: 1, 128>}, {transform_indices = @transform_6, window_bounds = array<i64: 32, 128>}, {transform_indices = @transform_7, window_bounds = array<i64: 32, 128>}]} {
    %c0 = arith.constant 0 : index
    %c0_0 = arith.constant 0 : index
    %0 = vector.load %arg1[%c0, %c0_0] : memref<32x128xf32, #tpu.memory_space<vmem>>, vector<32x128xf32>
    %c0_1 = arith.constant 0 : index
    %c0_2 = arith.constant 0 : index
    %1 = vector.load %arg3[%c0_1, %c0_2] : memref<128x128xf32, #tpu.memory_space<vmem>>, vector<128x128xf32>
    %cst = arith.constant dense<0.000000e+00> : vector<32x128xf32>
    %2 = tpu.matmul %0, %1, %cst {dimension_numbers = #tpu.dot_dimension_numbers<[1], [0], [0], [1], [0, 0, 1, 1], [], []>} : vector<32x128xf32>, vector<128x128xf32>, vector<32x128xf32> -> vector<32x128xf32>
    %c0_3 = arith.constant 0 : index
    %c0_4 = arith.constant 0 : index
    %3 = vector.load %arg5[%c0_3, %c0_4] : memref<1x128xf32, #tpu.memory_space<vmem>>, vector<1x128xf32>
    %4 = vector.broadcast %3 : vector<1x128xf32> to vector<32x128xf32>
    %5 = arith.addf %2, %4 : vector<32x128xf32>
    %cst_5 = arith.constant 0.000000e+00 : f32
    %6 = vector.broadcast %cst_5 : f32 to vector<32x128xf32>
    %7 = arith.maximumf %5, %6 : vector<32x128xf32>
    %c0_6 = arith.constant 0 : index
    %c0_7 = arith.constant 0 : index
    %8 = vector.load %arg7[%c0_6, %c0_7] : memref<32x128xf32, #tpu.memory_space<vmem>>, vector<32x128xf32>
    tpu.vector_store %arg7[%c0_6, %c0_7], %7 {strides = array<i32>} : memref<32x128xf32, #tpu.memory_space<vmem>>, vector<32x128xf32>,
    %c0_8 = arith.constant 0 : index
    %c0_9 = arith.constant 0 : index
    %9 = vector.load %arg2[%c0_8, %c0_9] : memref<32x128xf32, #tpu.memory_space<vmem>>, vector<32x128xf32>
    %c0_10 = arith.constant 0 : index
    %c0_11 = arith.constant 0 : index
    %10 = vector.load %arg4[%c0_10, %c0_11] : memref<128x128xf32, #tpu.memory_space<vmem>>, vector<128x128xf32>
    %cst_12 = arith.constant dense<0.000000e+00> : vector<32x128xf32>
    %11 = tpu.matmul %9, %10, %cst_12 {dimension_numbers = #tpu.dot_dimension_numbers<[1], [0], [0], [1], [0, 0, 1, 1], [], []>} : vector<32x128xf32>, vector<128x128xf32>, vector<32x128xf32> -> vector<32x128xf32>
    %c0_13 = arith.constant 0 : index
    %c0_14 = arith.constant 0 : index
    %12 = vector.load %arg6[%c0_13, %c0_14] : memref<1x128xf32, #tpu.memory_space<vmem>>, vector<1x128xf32>
    %13 = vector.broadcast %12 : vector<1x128xf32> to vector<32x128xf32>
    %14 = arith.addf %11, %13 : vector<32x128xf32>
    %cst_15 = arith.constant 0.000000e+00 : f32
    %15 = vector.broadcast %cst_15 : f32 to vector<32x128xf32>
    %16 = arith.maximumf %14, %15 : vector<32x128xf32>
    %c0_16 = arith.constant 0 : index
    %c0_17 = arith.constant 0 : index
    %17 = vector.load %arg8[%c0_16, %c0_17] : memref<32x128xf32, #tpu.memory_space<vmem>>, vector<32x128xf32>
    tpu.vector_store %arg8[%c0_16, %c0_17], %16 {strides = array<i32>} : memref<32x128xf32, #tpu.memory_space<vmem>>, vector<32x128xf32>,
    return
  }
  func.func @transform_0(%arg0: i32) -> (i32, i32) {
    %c0_i32 = arith.constant 0 : i32
    %c0_i32_0 = arith.constant 0 : i32
    return %arg0, %c0_i32 : i32, i32
  }
  func.func @transform_1(%arg0: i32) -> (i32, i32) {
    %c0_i32 = arith.constant 0 : i32
    %c0_i32_0 = arith.constant 0 : i32
    return %arg0, %c0_i32 : i32, i32
  }
  func.func @transform_2(%arg0: i32) -> (i32, i32) {
    %c0_i32 = arith.constant 0 : i32
    %c0_i32_0 = arith.constant 0 : i32
    %c0_i32_1 = arith.constant 0 : i32
    return %c0_i32, %c0_i32_0 : i32, i32
  }
  func.func @transform_3(%arg0: i32) -> (i32, i32) {
    %c0_i32 = arith.constant 0 : i32
    %c0_i32_0 = arith.constant 0 : i32
    %c0_i32_1 = arith.constant 0 : i32
    return %c0_i32, %c0_i32_0 : i32, i32
  }
  func.func @transform_4(%arg0: i32) -> (i32, i32) {
    %c0_i32 = arith.constant 0 : i32
    %c0_i32_0 = arith.constant 0 : i32
    %c0_i32_1 = arith.constant 0 : i32
    return %c0_i32, %c0_i32_0 : i32, i32
  }
  func.func @transform_5(%arg0: i32) -> (i32, i32) {
    %c0_i32 = arith.constant 0 : i32
    %c0_i32_0 = arith.constant 0 : i32
    %c0_i32_1 = arith.constant 0 : i32
    return %c0_i32, %c0_i32_0 : i32, i32
  }
  func.func @transform_6(%arg0: i32) -> (i32, i32) {
    %c0_i32 = arith.constant 0 : i32
    %c0_i32_0 = arith.constant 0 : i32
    return %arg0, %c0_i32 : i32, i32
  }
  func.func @transform_7(%arg0: i32) -> (i32, i32) {
    %c0_i32 = arith.constant 0 : i32
    %c0_i32_0 = arith.constant 0 : i32
    return %arg0, %c0_i32 : i32, i32
  }
}

</mosaic_0001>

<bundles_post_ra>
// kernel: squeeze.5
= control target key start
LH: loop header
LB: loop body
LE: loop exit
PB: predicated region body
PF: predicated region fallthrough
CT: control target
= control target key end

     0   :  { %s258_s8 = smov 116   ;;  %s259_s9 = smov 120   ;;  %vm7_vm0 = vcmask 31744   ;;  %s429_s0 = inlined_call_operand.vmem [shape: f32[128], index: 0, kind: input, shape index: {}]   ;;  %s430_s1 = inlined_call_operand.vmem [shape: f32[32,4], index: 1, kind: output, shape index: {}]  }
   0x1   :  { %v4_v0 = vld [vmem:[%s429_s0] sm:$0x1]  ;;  %s257_s0 = smov 124   ;;  %s260_s10 = smov 112  }
   0x2   :  { %5 = vst [vmem:[#allocation0] sm:$0x1] %v4_v0  ;;  %s261_s11 = smov 108   ;;  %s262_s12 = smov 104  }
   0x3   :  { %s263_s13 = smov 100   ;;  %s264_s14 = smov 96  }
   0x4   :  { %s265_s15 = smov 92   ;;  %s266_s16 = smov 88  }
   0x5   :  { %s267_s17 = smov 84   ;;  %s268_s18 = smov 80  }
   0x6   :  { %s269_s19 = smov 76   ;;  %s270_s20 = smov 72  }
   0x7   :  { %s271_s21 = smov 68   ;;  %s272_s22 = smov 64  }
   0x8   :  { %s273_s23 = smov 60   ;;  %s274_s24 = smov 56  }
   0x9   :  { %v9_v1 = vld [vmem:[#allocation0] sm:$0x1]   ;;  %s275_s25 = smov 52   ;;  %s276_s26 = smov 48  }
   0xa   :  { %v21_v2 = vld [vmem:[#allocation0] sm:$0x1]   ;;  %10 = vrot.lane.b32.xlu0 %v9_v1, %s257_s0  ;;  %s277_s27 = smov 44   ;;  %s278_s28 = smov 40  }
   0xb   :  { %22 = vrot.lane.b32.xlu1 %v21_v2, %s258_s8  ;;  %v15_v3 = vld [vmem:[#allocation0] sm:$0x1]   ;;  %s279_s29 = smov 36   ;;  %s280_s30 = smov 32  }
   0xc   :  { %v27_v4 = vld [vmem:[#allocation0] sm:$0x1]   ;;  %s281_s4 = smov 28   ;;  %s282_s5 = smov 24  }
   0xd   :  { %v33_v5 = vld [vmem:[#allocation0] sm:$0x1]   ;;  %s283_s6 = smov 20   ;;  %s284_s7 = smov 16  }
   0xe   :  { %16 = vrot.lane.b32.xlu0 %v15_v3, %s259_s9  ;;  %v39_v6 = vld [vmem:[#allocation0] sm:$0x1]   ;;  %s285_s0 = smov 12   ;;  %s286_s8 = smov 8  }
   0xf   :  { %28 = vrot.lane.b32.xlu1 %v27_v4, %s260_s10  ;;  %v45_v7 = vld [vmem:[#allocation0] sm:$0x1]   ;;  %s287_s9 = smov 4  }
  0x10   :  { %v51_v8 = vld [vmem:[#allocation0] sm:$0x1]  }
  0x11   :  { %v57_v9 = vld [vmem:[#allocation0] sm:$0x1]  }
  0x12   :  { %34 = vrot.lane.b32.xlu0 %v33_v5, %s261_s11  ;;  %v63_v10 = vld [vmem:[#allocation0] sm:$0x1]  }
  0x13   :  { %40 = vrot.lane.b32.xlu1 %v39_v6, %s262_s12  ;;  %v69_v11 = vld [vmem:[#allocation0] sm:$0x1]  }
  0x14   :  { %v75_v12 = vld [vmem:[#allocation0] sm:$0x1]  }
  0x15   :  { %v81_v13 = vld [vmem:[#allocation0] sm:$0x1]  }
  0x16   :  { %46 = vrot.lane.b32.xlu0 %v45_v7, %s263_s13  ;;  %v87_v14 = vld [vmem:[#allocation0] sm:$0x1]  }
  0x17   :  { %52 = vrot.lane.b32.xlu1 %v51_v8, %s264_s14  ;;  %v93_v15 = vld [vmem:[#allocation0] sm:$0x1]  }
  0x18   :  { %v99_v16 = vld [vmem:[#allocation0] sm:$0x1]  }
  0x19   :  { %v105_v17 = vld [vmem:[#allocation0] sm:$0x1]  }
  0x1a   :  { %58 = vrot.lane.b32.xlu0 %v57_v9, %s265_s15  ;;  %v111_v18 = vld [vmem:[#allocation0] sm:$0x1]  }
  0x1b   :  { %64 = vrot.lane.b32.xlu1 %v63_v10, %s266_s16  ;;  %v117_v19 = vld [vmem:[#allocation0] sm:$0x1]  }
  0x1c   :  { %v123_v20 = vld [vmem:[#allocation0] sm:$0x1]  }
  0x1d   :  { %v129_v21 = vld [vmem:[#allocation0] sm:$0x1]  }
  0x1e   :  { %70 = vrot.lane.b32.xlu0 %v69_v11, %s267_s17  ;;  %v135_v22 = vld [vmem:[#allocation0] sm:$0x1]  }
  0x1f   :  { %76 = vrot.lane.b32.xlu1 %v75_v12, %s268_s18  ;;  %v141_v23 = vld [vmem:[#allocation0] sm:$0x1]  }
  0x20   :  { %v147_v24 = vld [vmem:[#allocation0] sm:$0x1]  }
  0x21   :  { %v153_v25 = vld [vmem:[#allocation0] sm:$0x1]  }
  0x22   :  { %82 = vrot.lane.b32.xlu0 %v81_v13, %s269_s19  ;;  %v159_v26 = vld [vmem:[#allocation0] sm:$0x1]  }
  0x23   :  { %88 = vrot.lane.b32.xlu1 %v87_v14, %s270_s20  ;;  %v6_v27 = vld [vmem:[#allocation0] sm:$0x1]  }
  0x24   :  { %8 = vst.msk [vmem:[%s430_s1] sm:$0x1] %vm7_vm0, %v6_v27   ;;  %v165_v28 = vld [vmem:[#allocation0] sm:$0x1]  }
  0x25   :  { %v171_v29 = vld [vmem:[#allocation0] sm:$0x1]  }
  0x26   :  { %94 = vrot.lane.b32.xlu0 %v93_v15, %s271_s21  ;;  %v177_v30 = vld [vmem:[#allocation0] sm:$0x1]  }
  0x27   :  { %100 = vrot.lane.b32.xlu1 %v99_v16, %s272_s22  ;;  %v183_v31 = vld [vmem:[#allocation0] sm:$0x1]  }
  0x28   :  { %v189_v32 = vld [vmem:[#allocation0] sm:$0x1]  }
  0x2a   :  { %106 = vrot.lane.b32.xlu0 %v105_v17, %s273_s23 }
  0x2b   :  { %112 = vrot.lane.b32.xlu1 %v111_v18, %s274_s24 }
  0x2e   :  { %118 = vrot.lane.b32.xlu0 %v117_v19, %s275_s25 }
  0x2f   :  { %124 = vrot.lane.b32.xlu1 %v123_v20, %s276_s26 }
  0x32   :  { %130 = vrot.lane.b32.xlu0 %v129_v21, %s277_s27 }
  0x33   :  { %136 = vrot.lane.b32.xlu1 %v135_v22, %s278_s28 }
  0x36   :  { %142 = vrot.lane.b32.xlu0 %v141_v23, %s279_s29 }
  0x37   :  { %148 = vrot.lane.b32.xlu1 %v147_v24, %s280_s30 }
  0x3a   :  { %154 = vrot.lane.b32.xlu0 %v153_v25, %s281_s4 }
  0x3b   :  { %160 = vrot.lane.b32.xlu1 %v159_v26, %s282_s5 }
  0x3e   :  { %166 = vrot.lane.b32.xlu0 %v165_v28, %s283_s6 }
  0x3f   :  { %172 = vrot.lane.b32.xlu1 %v171_v29, %s284_s7 }
  0x42   :  { %178 = vrot.lane.b32.xlu0 %v177_v30, %s285_s0 }
  0x43   :  { %184 = vrot.lane.b32.xlu1 %v183_v31, %s286_s8 }
  0x46   :  { %190 = vrot.lane.b32.xlu0 %v189_v32, %s287_s9 }
  0x7c   :  { %v11_v33 = vpop.permute.xlu0 %10  }
  0x7d   :  { %v23_v34 = vpop.permute.xlu1 %22   ;;  %195 = vst.msk [vmem:[%s430_s1 + $0x1] sm:$0x1] %vm7_vm0, %v11_v33  }
  0x7e   :  { %197 = vst.msk [vmem:[%s430_s1 + $0x3] sm:$0x1] %vm7_vm0, %v23_v34  }
  0x80   :  { %v17_v35 = vpop.permute.xlu0 %16  }
  0x81   :  { %v29_v36 = vpop.permute.xlu1 %28   ;;  %196 = vst.msk [vmem:[%s430_s1 + $0x2] sm:$0x1] %vm7_vm0, %v17_v35  }
  0x82   :  { %198 = vst.msk [vmem:[%s430_s1 + $0x4] sm:$0x1] %vm7_vm0, %v29_v36  }
  0x84   :  { %v35_v37 = vpop.permute.xlu0 %34  }
  0x85   :  { %v41_v38 = vpop.permute.xlu1 %40   ;;  %199 = vst.msk [vmem:[%s430_s1 + $0x5] sm:$0x1] %vm7_vm0, %v35_v37  }
  0x86   :  { %200 = vst.msk [vmem:[%s430_s1 + $0x6] sm:$0x1] %vm7_vm0, %v41_v38  }
  0x88   :  { %v47_v39 = vpop.permute.xlu0 %46  }
  0x89   :  { %v53_v40 = vpop.permute.xlu1 %52   ;;  %201 = vst.msk [vmem:[%s430_s1 + $0x7] sm:$0x1] %vm7_vm0, %v47_v39  }
  0x8a   :  { %202 = vst.msk [vmem:[%s430_s1 + $0x8] sm:$0x1] %vm7_vm0, %v53_v40  }
  0x8c   :  { %v59_v41 = vpop.permute.xlu0 %58  }
  0x8d   :  { %v65_v42 = vpop.permute.xlu1 %64   ;;  %203 = vst.msk [vmem:[%s430_s1 + $0x9] sm:$0x1] %vm7_vm0, %v59_v41  }
  0x8e   :  { %204 = vst.msk [vmem:[%s430_s1 + $0xa] sm:$0x1] %vm7_vm0, %v65_v42  }
  0x90   :  { %v71_v43 = vpop.permute.xlu0 %70  }
  0x91   :  { %v77_v44 = vpop.permute.xlu1 %76   ;;  %205 = vst.msk [vmem:[%s430_s1 + $0xb] sm:$0x1] %vm7_vm0, %v71_v43  }
  0x92   :  { %206 = vst.msk [vmem:[%s430_s1 + $0xc] sm:$0x1] %vm7_vm0, %v77_v44  }
  0x94   :  { %v83_v45 = vpop.permute.xlu0 %82  }
  0x95   :  { %v89_v46 = vpop.permute.xlu1 %88   ;;  %207 = vst.msk [vmem:[%s430_s1 + $0xd] sm:$0x1] %vm7_vm0, %v83_v45  }
  0x96   :  { %208 = vst.msk [vmem:[%s430_s1 + $0xe] sm:$0x1] %vm7_vm0, %v89_v46  }
  0x98   :  { %v95_v47 = vpop.permute.xlu0 %94  }
  0x99   :  { %v101_v48 = vpop.permute.xlu1 %100   ;;  %209 = vst.msk [vmem:[%s430_s1 + $0xf] sm:$0x1] %vm7_vm0, %v95_v47  }
  0x9a   :  { %210 = vst.msk [vmem:[%s430_s1 + $0x10] sm:$0x1] %vm7_vm0, %v101_v48  }
  0x9c   :  { %v107_v49 = vpop.permute.xlu0 %106  }
  0x9d   :  { %v113_v50 = vpop.permute.xlu1 %112   ;;  %211 = vst.msk [vmem:[%s430_s1 + $0x11] sm:$0x1] %vm7_vm0, %v107_v49  }
  0x9e   :  { %212 = vst.msk [vmem:[%s430_s1 + $0x12] sm:$0x1] %vm7_vm0, %v113_v50  }
  0xa0   :  { %v119_v51 = vpop.permute.xlu0 %118  }
  0xa1   :  { %v125_v52 = vpop.permute.xlu1 %124   ;;  %213 = vst.msk [vmem:[%s430_s1 + $0x13] sm:$0x1] %vm7_vm0, %v119_v51  }
  0xa2   :  { %214 = vst.msk [vmem:[%s430_s1 + $0x14] sm:$0x1] %vm7_vm0, %v125_v52  }
  0xa4   :  { %v131_v53 = vpop.permute.xlu0 %130  }
  0xa5   :  { %v137_v54 = vpop.permute.xlu1 %136   ;;  %215 = vst.msk [vmem:[%s430_s1 + $0x15] sm:$0x1] %vm7_vm0, %v131_v53  }
  0xa6   :  { %216 = vst.msk [vmem:[%s430_s1 + $0x16] sm:$0x1] %vm7_vm0, %v137_v54  }
  0xa8   :  { %v143_v55 = vpop.permute.xlu0 %142  }
  0xa9   :  { %v149_v56 = vpop.permute.xlu1 %148   ;;  %217 = vst.msk [vmem:[%s430_s1 + $0x17] sm:$0x1] %vm7_vm0, %v143_v55  }
  0xaa   :  { %218 = vst.msk [vmem:[%s430_s1 + $0x18] sm:$0x1] %vm7_vm0, %v149_v56  }
  0xac   :  { %v155_v57 = vpop.permute.xlu0 %154  }
  0xad   :  { %v161_v58 = vpop.permute.xlu1 %160   ;;  %219 = vst.msk [vmem:[%s430_s1 + $0x19] sm:$0x1] %vm7_vm0, %v155_v57  }
  0xae   :  { %220 = vst.msk [vmem:[%s430_s1 + $0x1a] sm:$0x1] %vm7_vm0, %v161_v58  }
  0xb0   :  { %v167_v59 = vpop.permute.xlu0 %166  }
  0xb1   :  { %v173_v60 = vpop.permute.xlu1 %172   ;;  %221 = vst.msk [vmem:[%s430_s1 + $0x1b] sm:$0x1] %vm7_vm0, %v167_v59  }
  0xb2   :  { %222 = vst.msk [vmem:[%s430_s1 + $0x1c] sm:$0x1] %vm7_vm0, %v173_v60  }
  0xb4   :  { %v179_v61 = vpop.permute.xlu0 %178  }
  0xb5   :  { %v185_v62 = vpop.permute.xlu1 %184   ;;  %223 = vst.msk [vmem:[%s430_s1 + $0x1d] sm:$0x1] %vm7_vm0, %v179_v61  }
  0xb6   :  { %224 = vst.msk [vmem:[%s430_s1 + $0x1e] sm:$0x1] %vm7_vm0, %v185_v62  }
  0xb8   :  { %v191_v63 = vpop.permute.xlu0 %190  }
  0xb9   :  { %225 = vst.msk [vmem:[%s430_s1 + $0x1f] sm:$0x1] %vm7_vm0, %v191_v63  }

// kernel: tile.23
= control target key start
LH: loop header
LB: loop body
LE: loop exit
PB: predicated region body
PF: predicated region fallthrough
CT: control target
= control target key end

     0   :  { %s40_s0 = inlined_call_operand.vmem [shape: f32[4], index: 0, kind: input, shape index: {}]   ;;  %s41_s1 = inlined_call_operand.vmem [shape: f32[32,4], index: 1, kind: output, shape index: {}]  }
   0x1   :  { %v4_v0 = vld [vmem:[%s40_s0] ss:$0 sm:$0xff] }
   0x2   :  { %5 = vst [vmem:[%s41_s1] sm:$0xff] %v4_v0  ;;  %12 = vst [vmem:[%s41_s1 + $0x8] sm:$0xff] %v4_v0 }
   0x3   :  { %13 = vst [vmem:[%s41_s1 + $0x10] sm:$0xff] %v4_v0  ;;  %14 = vst [vmem:[%s41_s1 + $0x18] sm:$0xff] %v4_v0 }

// kernel: mul.39
= control target key start
LH: loop header
LB: loop body
LE: loop exit
PB: predicated region body
PF: predicated region fallthrough
CT: control target
= control target key end

     0   :  { %s259_s10 = smov 124   ;;  %s260_s11 = smov 116   ;;  %vm3_vm0 = vcmask 31744   ;;  %vm9_vm1 = vcmask 1048544   ;;  %vm15_vm2 = vcmask 1015744   ;;  %vm21_vm3 = vcmask 982944   ;;  %s399_s0 = inlined_call_operand.vmem [shape: f32[32,4], index: 0, kind: input, shape index: {}]   ;;  %s400_s1 = inlined_call_operand.vmem [shape: f32[128], index: 1, kind: output, shape index: {}]  }
   0x1   :  { %v197_v0 = vld [vmem:[%s399_s0 + $0x1f] sm:$0x1]   ;;  %v199_v1 = vld [vmem:[%s399_s0 + $0x1d] sm:$0x1]   ;;  %v198_v2 = vld [vmem:[%s399_s0 + $0x1e] sm:$0x1]  }
   0x2   :  { %7 = vrot.lane.b32.xlu0 %v197_v0, %s259_s10  ;;  %19 = vrot.lane.b32.xlu1 %v199_v1, %s260_s11  ;;  %v200_v3 = vld [vmem:[%s399_s0 + $0x1c] sm:$0x1]   ;;  %s261_s16 = smov 120   ;;  %s262_s17 = smov 112   ;;  %v201_v4 = vld [vmem:[%s399_s0 + $0x1b] sm:$0x1]  }
   0x3   :  { %v202_v5 = vld [vmem:[%s399_s0 + $0x1a] sm:$0x1]   ;;  %s263_s22 = smov 108   ;;  %s264_s23 = smov 104   ;;  %v203_v6 = vld [vmem:[%s399_s0 + $0x19] sm:$0x1]  }
   0x4   :  { %v204_v7 = vld [vmem:[%s399_s0 + $0x18] sm:$0x1]   ;;  %s265_s28 = smov 100   ;;  %s266_s29 = smov 96   ;;  %v205_v8 = vld [vmem:[%s399_s0 + $0x17] sm:$0x1]  }
   0x5   :  { %v206_v9 = vld [vmem:[%s399_s0 + $0x16] sm:$0x1]   ;;  %v2_v10 = vld [vmem:[%s399_s0] sm:$0x1]   ;;  %s267_s7 = smov 92   ;;  %s268_s8 = smov 88  }
   0x6   :  { %13 = vrot.lane.b32.xlu0 %v198_v2, %s261_s16  ;;  %25 = vrot.lane.b32.xlu1 %v200_v3, %s262_s17  ;;  %4 = vst.msk [vmem:[#allocation0] sm:$0x1] %vm3_vm0, %v2_v10   ;;  %v207_v11 = vld [vmem:[%s399_s0 + $0x15] sm:$0x1]   ;;  %v208_v12 = vld [vmem:[%s399_s0 + $0x14] sm:$0x1]  }
   0x7   :  { %s269_s13 = smov 84   ;;  %s270_s14 = smov 80   ;;  %v209_v13 = vld [vmem:[%s399_s0 + $0x13] sm:$0x1]   ;;  %v210_v14 = vld [vmem:[%s399_s0 + $0x12] sm:$0x1]  }
   0x8   :  { %s271_s19 = smov 76   ;;  %s272_s20 = smov 72   ;;  %v211_v15 = vld [vmem:[%s399_s0 + $0x11] sm:$0x1]   ;;  %v212_v16 = vld [vmem:[%s399_s0 + $0x10] sm:$0x1]  }
   0x9   :  { %s273_s25 = smov 68   ;;  %s274_s26 = smov 64   ;;  %v213_v17 = vld [vmem:[%s399_s0 + $0xf] sm:$0x1]   ;;  %v214_v18 = vld [vmem:[%s399_s0 + $0xe] sm:$0x1]  }
   0xa   :  { %31 = vrot.lane.b32.xlu0 %v201_v4, %s263_s22  ;;  %37 = vrot.lane.b32.xlu1 %v202_v5, %s264_s23  ;;  %s275_s2 = smov 60   ;;  %s276_s3 = smov 56   ;;  %v215_v19 = vld [vmem:[%s399_s0 + $0xd] sm:$0x1]   ;;  %v216_v20 = vld [vmem:[%s399_s0 + $0xc] sm:$0x1]  }
   0xb   :  { %s278_s9 = smov 48   ;;  %v217_v21 = vld [vmem:[%s399_s0 + $0xb] sm:$0x1]   ;;  %v218_v22 = vld [vmem:[%s399_s0 + $0xa] sm:$0x1]   ;;  %s280_s15 = smov 40  }
   0xc   :  { %v219_v23 = vld [vmem:[%s399_s0 + $0x9] sm:$0x1]   ;;  %v220_v24 = vld [vmem:[%s399_s0 + $0x8] sm:$0x1]   ;;  %s282_s21 = smov 32   ;;  %s284_s27 = smov 24  }
   0xd   :  { %v221_v25 = vld [vmem:[%s399_s0 + $0x7] sm:$0x1]   ;;  %v222_v26 = vld [vmem:[%s399_s0 + $0x6] sm:$0x1]   ;;  %v223_v27 = vld [vmem:[%s399_s0 + $0x5] sm:$0x1]  }
   0xe   :  { %43 = vrot.lane.b32.xlu0 %v203_v6, %s265_s28  ;;  %49 = vrot.lane.b32.xlu1 %v204_v7, %s266_s29  ;;  %v224_v28 = vld [vmem:[%s399_s0 + $0x4] sm:$0x1]   ;;  %s286_s4 = smov 16   ;;  %v225_v29 = vld [vmem:[%s399_s0 + $0x3] sm:$0x1]   ;;  %s288_s10 = smov 8  }
   0xf   :  { %v226_v30 = vld [vmem:[%s399_s0 + $0x2] sm:$0x1]   ;;  %v227_v31 = vld [vmem:[%s399_s0 + $0x1] sm:$0x1]   ;;  %s289_s0 = smov 4   ;;  %vm27_vm4 = vcmask 950144  }
  0x10   :  { %vm33_vm5 = vcmask 917344   ;;  %vm39_vm6 = vcmask 884544   ;;  %vm45_vm7 = vcmask 851744   ;;  %vm51_vm8 = vcmask 818944  }
  0x11   :  { %vm57_vm9 = vcmask 786144   ;;  %vm63_vm10 = vcmask 753344   ;;  %vm69_vm11 = vcmask 720544   ;;  %vm75_vm12 = vcmask 687744  }
  0x12   :  { %55 = vrot.lane.b32.xlu0 %v205_v8, %s267_s7  ;;  %61 = vrot.lane.b32.xlu1 %v206_v9, %s268_s8  ;;  %s277_s8 = smov 52   ;;  %vm81_vm13 = vcmask 654944   ;;  %vm87_vm14 = vcmask 622144   ;;  %vm93_vm15 = vcmask 589344   ;;  %vm99_vm0 = vcmask 556544  }
  0x16   :  { %67 = vrot.lane.b32.xlu0 %v207_v11, %s269_s13  ;;  %73 = vrot.lane.b32.xlu1 %v208_v12, %s270_s14  ;;  %s279_s14 = smov 44  }
  0x1a   :  { %79 = vrot.lane.b32.xlu0 %v209_v13, %s271_s19  ;;  %85 = vrot.lane.b32.xlu1 %v210_v14, %s272_s20  ;;  %s281_s20 = smov 36  }
  0x1e   :  { %91 = vrot.lane.b32.xlu0 %v211_v15, %s273_s25  ;;  %97 = vrot.lane.b32.xlu1 %v212_v16, %s274_s26  ;;  %s283_s26 = smov 28  }
  0x22   :  { %103 = vrot.lane.b32.xlu0 %v213_v17, %s275_s2  ;;  %109 = vrot.lane.b32.xlu1 %v214_v18, %s276_s3  ;;  %s285_s3 = smov 20  }
  0x26   :  { %115 = vrot.lane.b32.xlu0 %v215_v19, %s277_s8  ;;  %121 = vrot.lane.b32.xlu1 %v216_v20, %s278_s9  ;;  %s287_s9 = smov 12  }
  0x2a   :  { %127 = vrot.lane.b32.xlu0 %v217_v21, %s279_s14  ;;  %133 = vrot.lane.b32.xlu1 %v218_v22, %s280_s15 }
  0x2e   :  { %139 = vrot.lane.b32.xlu0 %v219_v23, %s281_s20  ;;  %145 = vrot.lane.b32.xlu1 %v220_v24, %s282_s21 }
  0x32   :  { %151 = vrot.lane.b32.xlu0 %v221_v25, %s283_s26  ;;  %157 = vrot.lane.b32.xlu1 %v222_v26, %s284_s27 }
  0x36   :  { %163 = vrot.lane.b32.xlu0 %v223_v27, %s285_s3  ;;  %169 = vrot.lane.b32.xlu1 %v224_v28, %s286_s4 }
  0x3a   :  { %175 = vrot.lane.b32.xlu0 %v225_v29, %s287_s9  ;;  %181 = vrot.lane.b32.xlu1 %v226_v30, %s288_s10 }
  0x3e   :  { %187 = vrot.lane.b32.xlu0 %v227_v31, %s289_s0 }
  0x74   :  { %v8_v32 = vpop.permute.xlu0 %7   ;;  %v20_v33 = vpop.permute.xlu1 %19  }
  0x75   :  { %10 = vst.msk [vmem:[#allocation0] sm:$0x1] %vm9_vm1, %v8_v32   ;;  %vm105_vm1 = vcmask 523744  }
  0x78   :  { %v14_v34 = vpop.permute.xlu0 %13   ;;  %v26_v35 = vpop.permute.xlu1 %25  }
  0x79   :  { %16 = vst.msk [vmem:[#allocation0] sm:$0x1] %vm15_vm2, %v14_v34   ;;  %vm111_vm2 = vcmask 490944  }
  0x7a   :  { %22 = vst.msk [vmem:[#allocation0] sm:$0x1] %vm21_vm3, %v20_v33   ;;  %vm117_vm3 = vcmask 458144  }
  0x7b   :  { %28 = vst.msk [vmem:[#allocation0] sm:$0x1] %vm27_vm4, %v26_v35   ;;  %vm123_vm4 = vcmask 425344  }
  0x7c   :  { %v32_v36 = vpop.permute.xlu0 %31   ;;  %v38_v37 = vpop.permute.xlu1 %37  }
  0x7d   :  { %34 = vst.msk [vmem:[#allocation0] sm:$0x1] %vm33_vm5, %v32_v36   ;;  %vm129_vm5 = vcmask 392544  }
  0x7e   :  { %40 = vst.msk [vmem:[#allocation0] sm:$0x1] %vm39_vm6, %v38_v37   ;;  %vm135_vm6 = vcmask 359744  }
  0x80   :  { %v44_v38 = vpop.permute.xlu0 %43   ;;  %v50_v39 = vpop.permute.xlu1 %49  }
  0x81   :  { %46 = vst.msk [vmem:[#allocation0] sm:$0x1] %vm45_vm7, %v44_v38   ;;  %vm141_vm7 = vcmask 326944  }
  0x82   :  { %52 = vst.msk [vmem:[#allocation0] sm:$0x1] %vm51_vm8, %v50_v39   ;;  %vm147_vm8 = vcmask 294144  }
  0x84   :  { %v56_v40 = vpop.permute.xlu0 %55   ;;  %v62_v41 = vpop.permute.xlu1 %61  }
  0x85   :  { %58 = vst.msk [vmem:[#allocation0] sm:$0x1] %vm57_vm9, %v56_v40   ;;  %vm153_vm9 = vcmask 261344  }
  0x86   :  { %64 = vst.msk [vmem:[#allocation0] sm:$0x1] %vm63_vm10, %v62_v41   ;;  %vm159_vm10 = vcmask 228544  }
  0x88   :  { %v68_v42 = vpop.permute.xlu0 %67   ;;  %v74_v43 = vpop.permute.xlu1 %73  }
  0x89   :  { %70 = vst.msk [vmem:[#allocation0] sm:$0x1] %vm69_vm11, %v68_v42   ;;  %vm165_vm11 = vcmask 195744  }
  0x8a   :  { %76 = vst.msk [vmem:[#allocation0] sm:$0x1] %vm75_vm12, %v74_v43   ;;  %vm171_vm12 = vcmask 162944  }
  0x8c   :  { %v80_v44 = vpop.permute.xlu0 %79   ;;  %v86_v45 = vpop.permute.xlu1 %85  }
  0x8d   :  { %82 = vst.msk [vmem:[#allocation0] sm:$0x1] %vm81_vm13, %v80_v44   ;;  %vm177_vm13 = vcmask 130144  }
  0x8e   :  { %88 = vst.msk [vmem:[#allocation0] sm:$0x1] %vm87_vm14, %v86_v45   ;;  %vm183_vm14 = vcmask 97344  }
  0x90   :  { %v92_v46 = vpop.permute.xlu0 %91   ;;  %v98_v47 = vpop.permute.xlu1 %97  }
  0x91   :  { %94 = vst.msk [vmem:[#allocation0] sm:$0x1] %vm93_vm15, %v92_v46   ;;  %vm189_vm15 = vcmask 64544  }
  0x92   :  { %100 = vst.msk [vmem:[#allocation0] sm:$0x1] %vm99_vm0, %v98_v47  }
  0x94   :  { %v104_v48 = vpop.permute.xlu0 %103   ;;  %v110_v49 = vpop.permute.xlu1 %109  }
  0x95   :  { %106 = vst.msk [vmem:[#allocation0] sm:$0x1] %vm105_vm1, %v104_v48  }
  0x96   :  { %112 = vst.msk [vmem:[#allocation0] sm:$0x1] %vm111_vm2, %v110_v49  }
  0x98   :  { %v116_v50 = vpop.permute.xlu0 %115   ;;  %v122_v51 = vpop.permute.xlu1 %121  }
  0x99   :  { %118 = vst.msk [vmem:[#allocation0] sm:$0x1] %vm117_vm3, %v116_v50  }
  0x9a   :  { %124 = vst.msk [vmem:[#allocation0] sm:$0x1] %vm123_vm4, %v122_v51  }
  0x9c   :  { %v128_v52 = vpop.permute.xlu0 %127   ;;  %v134_v53 = vpop.permute.xlu1 %133  }
  0x9d   :  { %130 = vst.msk [vmem:[#allocation0] sm:$0x1] %vm129_vm5, %v128_v52  }
  0x9e   :  { %136 = vst.msk [vmem:[#allocation0] sm:$0x1] %vm135_vm6, %v134_v53  }
  0xa0   :  { %v140_v54 = vpop.permute.xlu0 %139   ;;  %v146_v55 = vpop.permute.xlu1 %145  }
  0xa1   :  { %142 = vst.msk [vmem:[#allocation0] sm:$0x1] %vm141_vm7, %v140_v54  }
  0xa2   :  { %148 = vst.msk [vmem:[#allocation0] sm:$0x1] %vm147_vm8, %v146_v55  }
  0xa4   :  { %v152_v56 = vpop.permute.xlu0 %151   ;;  %v158_v57 = vpop.permute.xlu1 %157  }
  0xa5   :  { %154 = vst.msk [vmem:[#allocation0] sm:$0x1] %vm153_vm9, %v152_v56  }
  0xa6   :  { %160 = vst.msk [vmem:[#allocation0] sm:$0x1] %vm159_vm10, %v158_v57  }
  0xa8   :  { %v164_v58 = vpop.permute.xlu0 %163   ;;  %v170_v59 = vpop.permute.xlu1 %169  }
  0xa9   :  { %166 = vst.msk [vmem:[#allocation0] sm:$0x1] %vm165_vm11, %v164_v58  }
  0xaa   :  { %172 = vst.msk [vmem:[#allocation0] sm:$0x1] %vm171_vm12, %v170_v59  }
  0xac   :  { %v176_v60 = vpop.permute.xlu0 %175   ;;  %v182_v61 = vpop.permute.xlu1 %181  }
  0xad   :  { %178 = vst.msk [vmem:[#allocation0] sm:$0x1] %vm177_vm13, %v176_v60  }
  0xae   :  { %184 = vst.msk [vmem:[#allocation0] sm:$0x1] %vm183_vm14, %v182_v61  }
  0xb0   :  { %v188_v62 = vpop.permute.xlu0 %187  }
  0xb1   :  { %190 = vst.msk [vmem:[#allocation0] sm:$0x1] %vm189_vm15, %v188_v62  }
  0xb8   :  { %v194_v63 = vld [vmem:[#allocation0] sm:$0x1] }
  0xb9   :  { %196 = vst [vmem:[%s400_s1] sm:$0x1] %v194_v63 }

// kernel: tile.34
= control target key start
LH: loop header
LB: loop body
LE: loop exit
PB: predicated region body
PF: predicated region fallthrough
CT: control target
= control target key end

     0   :  { %s259_s10 = smov 124   ;;  %s260_s11 = smov 116   ;;  %vm3_vm0 = vcmask 31744   ;;  %vm9_vm1 = vcmask 1048544   ;;  %vm15_vm2 = vcmask 1015744   ;;  %vm21_vm3 = vcmask 982944   ;;  %s399_s0 = inlined_call_operand.vmem [shape: f32[32,4], index: 0, kind: input, shape index: {}]   ;;  %s400_s1 = inlined_call_operand.vmem [shape: f32[1,128], index: 1, kind: output, shape index: {}]  }
   0x1   :  { %v197_v0 = vld [vmem:[%s399_s0 + $0x1f] sm:$0x1]   ;;  %v199_v1 = vld [vmem:[%s399_s0 + $0x1d] sm:$0x1]   ;;  %v198_v2 = vld [vmem:[%s399_s0 + $0x1e] sm:$0x1]  }
   0x2   :  { %7 = vrot.lane.b32.xlu0 %v197_v0, %s259_s10  ;;  %19 = vrot.lane.b32.xlu1 %v199_v1, %s260_s11  ;;  %v200_v3 = vld [vmem:[%s399_s0 + $0x1c] sm:$0x1]   ;;  %s261_s16 = smov 120   ;;  %s262_s17 = smov 112   ;;  %v201_v4 = vld [vmem:[%s399_s0 + $0x1b] sm:$0x1]  }
   0x3   :  { %v202_v5 = vld [vmem:[%s399_s0 + $0x1a] sm:$0x1]   ;;  %s263_s22 = smov 108   ;;  %s264_s23 = smov 104   ;;  %v203_v6 = vld [vmem:[%s399_s0 + $0x19] sm:$0x1]  }
   0x4   :  { %v204_v7 = vld [vmem:[%s399_s0 + $0x18] sm:$0x1]   ;;  %s265_s28 = smov 100   ;;  %s266_s29 = smov 96   ;;  %v205_v8 = vld [vmem:[%s399_s0 + $0x17] sm:$0x1]  }
   0x5   :  { %v206_v9 = vld [vmem:[%s399_s0 + $0x16] sm:$0x1]   ;;  %v2_v10 = vld [vmem:[%s399_s0] sm:$0x1]   ;;  %s267_s7 = smov 92   ;;  %s268_s8 = smov 88  }
   0x6   :  { %13 = vrot.lane.b32.xlu0 %v198_v2, %s261_s16  ;;  %25 = vrot.lane.b32.xlu1 %v200_v3, %s262_s17  ;;  %4 = vst.msk [vmem:[#allocation0] sm:$0x1] %vm3_vm0, %v2_v10   ;;  %v207_v11 = vld [vmem:[%s399_s0 + $0x15] sm:$0x1]   ;;  %v208_v12 = vld [vmem:[%s399_s0 + $0x14] sm:$0x1]  }
   0x7   :  { %s269_s13 = smov 84   ;;  %s270_s14 = smov 80   ;;  %v209_v13 = vld [vmem:[%s399_s0 + $0x13] sm:$0x1]   ;;  %v210_v14 = vld [vmem:[%s399_s0 + $0x12] sm:$0x1]  }
   0x8   :  { %s271_s19 = smov 76   ;;  %s272_s20 = smov 72   ;;  %v211_v15 = vld [vmem:[%s399_s0 + $0x11] sm:$0x1]   ;;  %v212_v16 = vld [vmem:[%s399_s0 + $0x10] sm:$0x1]  }
   0x9   :  { %s273_s25 = smov 68   ;;  %s274_s26 = smov 64   ;;  %v213_v17 = vld [vmem:[%s399_s0 + $0xf] sm:$0x1]   ;;  %v214_v18 = vld [vmem:[%s399_s0 + $0xe] sm:$0x1]  }
   0xa   :  { %31 = vrot.lane.b32.xlu0 %v201_v4, %s263_s22  ;;  %37 = vrot.lane.b32.xlu1 %v202_v5, %s264_s23  ;;  %s275_s2 = smov 60   ;;  %s276_s3 = smov 56   ;;  %v215_v19 = vld [vmem:[%s399_s0 + $0xd] sm:$0x1]   ;;  %v216_v20 = vld [vmem:[%s399_s0 + $0xc] sm:$0x1]  }
   0xb   :  { %s278_s9 = smov 48   ;;  %v217_v21 = vld [vmem:[%s399_s0 + $0xb] sm:$0x1]   ;;  %v218_v22 = vld [vmem:[%s399_s0 + $0xa] sm:$0x1]   ;;  %s280_s15 = smov 40  }
   0xc   :  { %v219_v23 = vld [vmem:[%s399_s0 + $0x9] sm:$0x1]   ;;  %v220_v24 = vld [vmem:[%s399_s0 + $0x8] sm:$0x1]   ;;  %s282_s21 = smov 32   ;;  %s284_s27 = smov 24  }
   0xd   :  { %v221_v25 = vld [vmem:[%s399_s0 + $0x7] sm:$0x1]   ;;  %v222_v26 = vld [vmem:[%s399_s0 + $0x6] sm:$0x1]   ;;  %v223_v27 = vld [vmem:[%s399_s0 + $0x5] sm:$0x1]  }
   0xe   :  { %43 = vrot.lane.b32.xlu0 %v203_v6, %s265_s28  ;;  %49 = vrot.lane.b32.xlu1 %v204_v7, %s266_s29  ;;  %v224_v28 = vld [vmem:[%s399_s0 + $0x4] sm:$0x1]   ;;  %s286_s4 = smov 16   ;;  %v225_v29 = vld [vmem:[%s399_s0 + $0x3] sm:$0x1]   ;;  %s288_s10 = smov 8  }
   0xf   :  { %v226_v30 = vld [vmem:[%s399_s0 + $0x2] sm:$0x1]   ;;  %v227_v31 = vld [vmem:[%s399_s0 + $0x1] sm:$0x1]   ;;  %s289_s0 = smov 4   ;;  %vm27_vm4 = vcmask 950144  }
  0x10   :  { %vm33_vm5 = vcmask 917344   ;;  %vm39_vm6 = vcmask 884544   ;;  %vm45_vm7 = vcmask 851744   ;;  %vm51_vm8 = vcmask 818944  }
  0x11   :  { %vm57_vm9 = vcmask 786144   ;;  %vm63_vm10 = vcmask 753344   ;;  %vm69_vm11 = vcmask 720544   ;;  %vm75_vm12 = vcmask 687744  }
  0x12   :  { %55 = vrot.lane.b32.xlu0 %v205_v8, %s267_s7  ;;  %61 = vrot.lane.b32.xlu1 %v206_v9, %s268_s8  ;;  %s277_s8 = smov 52   ;;  %vm81_vm13 = vcmask 654944   ;;  %vm87_vm14 = vcmask 622144   ;;  %vm93_vm15 = vcmask 589344   ;;  %vm99_vm0 = vcmask 556544  }
  0x16   :  { %67 = vrot.lane.b32.xlu0 %v207_v11, %s269_s13  ;;  %73 = vrot.lane.b32.xlu1 %v208_v12, %s270_s14  ;;  %s279_s14 = smov 44  }
  0x1a   :  { %79 = vrot.lane.b32.xlu0 %v209_v13, %s271_s19  ;;  %85 = vrot.lane.b32.xlu1 %v210_v14, %s272_s20  ;;  %s281_s20 = smov 36  }
  0x1e   :  { %91 = vrot.lane.b32.xlu0 %v211_v15, %s273_s25  ;;  %97 = vrot.lane.b32.xlu1 %v212_v16, %s274_s26  ;;  %s283_s26 = smov 28  }
  0x22   :  { %103 = vrot.lane.b32.xlu0 %v213_v17, %s275_s2  ;;  %109 = vrot.lane.b32.xlu1 %v214_v18, %s276_s3  ;;  %s285_s3 = smov 20  }
  0x26   :  { %115 = vrot.lane.b32.xlu0 %v215_v19, %s277_s8  ;;  %121 = vrot.lane.b32.xlu1 %v216_v20, %s278_s9  ;;  %s287_s9 = smov 12  }
  0x2a   :  { %127 = vrot.lane.b32.xlu0 %v217_v21, %s279_s14  ;;  %133 = vrot.lane.b32.xlu1 %v218_v22, %s280_s15 }
  0x2e   :  { %139 = vrot.lane.b32.xlu0 %v219_v23, %s281_s20  ;;  %145 = vrot.lane.b32.xlu1 %v220_v24, %s282_s21 }
  0x32   :  { %151 = vrot.lane.b32.xlu0 %v221_v25, %s283_s26  ;;  %157 = vrot.lane.b32.xlu1 %v222_v26, %s284_s27 }
  0x36   :  { %163 = vrot.lane.b32.xlu0 %v223_v27, %s285_s3  ;;  %169 = vrot.lane.b32.xlu1 %v224_v28, %s286_s4 }
  0x3a   :  { %175 = vrot.lane.b32.xlu0 %v225_v29, %s287_s9  ;;  %181 = vrot.lane.b32.xlu1 %v226_v30, %s288_s10 }
  0x3e   :  { %187 = vrot.lane.b32.xlu0 %v227_v31, %s289_s0 }
  0x74   :  { %v8_v32 = vpop.permute.xlu0 %7   ;;  %v20_v33 = vpop.permute.xlu1 %19  }
  0x75   :  { %10 = vst.msk [vmem:[#allocation0] sm:$0x1] %vm9_vm1, %v8_v32   ;;  %vm105_vm1 = vcmask 523744  }
  0x78   :  { %v14_v34 = vpop.permute.xlu0 %13   ;;  %v26_v35 = vpop.permute.xlu1 %25  }
  0x79   :  { %16 = vst.msk [vmem:[#allocation0] sm:$0x1] %vm15_vm2, %v14_v34   ;;  %vm111_vm2 = vcmask 490944  }
  0x7a   :  { %22 = vst.msk [vmem:[#allocation0] sm:$0x1] %vm21_vm3, %v20_v33   ;;  %vm117_vm3 = vcmask 458144  }
  0x7b   :  { %28 = vst.msk [vmem:[#allocation0] sm:$0x1] %vm27_vm4, %v26_v35   ;;  %vm123_vm4 = vcmask 425344  }
  0x7c   :  { %v32_v36 = vpop.permute.xlu0 %31   ;;  %v38_v37 = vpop.permute.xlu1 %37  }
  0x7d   :  { %34 = vst.msk [vmem:[#allocation0] sm:$0x1] %vm33_vm5, %v32_v36   ;;  %vm129_vm5 = vcmask 392544  }
  0x7e   :  { %40 = vst.msk [vmem:[#allocation0] sm:$0x1] %vm39_vm6, %v38_v37   ;;  %vm135_vm6 = vcmask 359744  }
  0x80   :  { %v44_v38 = vpop.permute.xlu0 %43   ;;  %v50_v39 = vpop.permute.xlu1 %49  }
  0x81   :  { %46 = vst.msk [vmem:[#allocation0] sm:$0x1] %vm45_vm7, %v44_v38   ;;  %vm141_vm7 = vcmask 326944  }
  0x82   :  { %52 = vst.msk [vmem:[#allocation0] sm:$0x1] %vm51_vm8, %v50_v39   ;;  %vm147_vm8 = vcmask 294144  }
  0x84   :  { %v56_v40 = vpop.permute.xlu0 %55   ;;  %v62_v41 = vpop.permute.xlu1 %61  }
  0x85   :  { %58 = vst.msk [vmem:[#allocation0] sm:$0x1] %vm57_vm9, %v56_v40   ;;  %vm153_vm9 = vcmask 261344  }
  0x86   :  { %64 = vst.msk [vmem:[#allocation0] sm:$0x1] %vm63_vm10, %v62_v41   ;;  %vm159_vm10 = vcmask 228544  }
  0x88   :  { %v68_v42 = vpop.permute.xlu0 %67   ;;  %v74_v43 = vpop.permute.xlu1 %73  }
  0x89   :  { %70 = vst.msk [vmem:[#allocation0] sm:$0x1] %vm69_vm11, %v68_v42   ;;  %vm165_vm11 = vcmask 195744  }
  0x8a   :  { %76 = vst.msk [vmem:[#allocation0] sm:$0x1] %vm75_vm12, %v74_v43   ;;  %vm171_vm12 = vcmask 162944  }
  0x8c   :  { %v80_v44 = vpop.permute.xlu0 %79   ;;  %v86_v45 = vpop.permute.xlu1 %85  }
  0x8d   :  { %82 = vst.msk [vmem:[#allocation0] sm:$0x1] %vm81_vm13, %v80_v44   ;;  %vm177_vm13 = vcmask 130144  }
  0x8e   :  { %88 = vst.msk [vmem:[#allocation0] sm:$0x1] %vm87_vm14, %v86_v45   ;;  %vm183_vm14 = vcmask 97344  }
  0x90   :  { %v92_v46 = vpop.permute.xlu0 %91   ;;  %v98_v47 = vpop.permute.xlu1 %97  }
  0x91   :  { %94 = vst.msk [vmem:[#allocation0] sm:$0x1] %vm93_vm15, %v92_v46   ;;  %vm189_vm15 = vcmask 64544  }
  0x92   :  { %100 = vst.msk [vmem:[#allocation0] sm:$0x1] %vm99_vm0, %v98_v47  }
  0x94   :  { %v104_v48 = vpop.permute.xlu0 %103   ;;  %v110_v49 = vpop.permute.xlu1 %109  }
  0x95   :  { %106 = vst.msk [vmem:[#allocation0] sm:$0x1] %vm105_vm1, %v104_v48  }
  0x96   :  { %112 = vst.msk [vmem:[#allocation0] sm:$0x1] %vm111_vm2, %v110_v49  }
  0x98   :  { %v116_v50 = vpop.permute.xlu0 %115   ;;  %v122_v51 = vpop.permute.xlu1 %121  }
  0x99   :  { %118 = vst.msk [vmem:[#allocation0] sm:$0x1] %vm117_vm3, %v116_v50  }
  0x9a   :  { %124 = vst.msk [vmem:[#allocation0] sm:$0x1] %vm123_vm4, %v122_v51  }
  0x9c   :  { %v128_v52 = vpop.permute.xlu0 %127   ;;  %v134_v53 = vpop.permute.xlu1 %133  }
  0x9d   :  { %130 = vst.msk [vmem:[#allocation0] sm:$0x1] %vm129_vm5, %v128_v52  }
  0x9e   :  { %136 = vst.msk [vmem:[#allocation0] sm:$0x1] %vm135_vm6, %v134_v53  }
  0xa0   :  { %v140_v54 = vpop.permute.xlu0 %139   ;;  %v146_v55 = vpop.permute.xlu1 %145  }
  0xa1   :  { %142 = vst.msk [vmem:[#allocation0] sm:$0x1] %vm141_vm7, %v140_v54  }
  0xa2   :  { %148 = vst.msk [vmem:[#allocation0] sm:$0x1] %vm147_vm8, %v146_v55  }
  0xa4   :  { %v152_v56 = vpop.permute.xlu0 %151   ;;  %v158_v57 = vpop.permute.xlu1 %157  }
  0xa5   :  { %154 = vst.msk [vmem:[#allocation0] sm:$0x1] %vm153_vm9, %v152_v56  }
  0xa6   :  { %160 = vst.msk [vmem:[#allocation0] sm:$0x1] %vm159_vm10, %v158_v57  }
  0xa8   :  { %v164_v58 = vpop.permute.xlu0 %163   ;;  %v170_v59 = vpop.permute.xlu1 %169  }
  0xa9   :  { %166 = vst.msk [vmem:[#allocation0] sm:$0x1] %vm165_vm11, %v164_v58  }
  0xaa   :  { %172 = vst.msk [vmem:[#allocation0] sm:$0x1] %vm171_vm12, %v170_v59  }
  0xac   :  { %v176_v60 = vpop.permute.xlu0 %175   ;;  %v182_v61 = vpop.permute.xlu1 %181  }
  0xad   :  { %178 = vst.msk [vmem:[#allocation0] sm:$0x1] %vm177_vm13, %v176_v60  }
  0xae   :  { %184 = vst.msk [vmem:[#allocation0] sm:$0x1] %vm183_vm14, %v182_v61  }
  0xb0   :  { %v188_v62 = vpop.permute.xlu0 %187  }
  0xb1   :  { %190 = vst.msk [vmem:[#allocation0] sm:$0x1] %vm189_vm15, %v188_v62  }
  0xb8   :  { %v194_v63 = vld [vmem:[#allocation0] sm:$0x1] }
  0xb9   :  { %196 = vst [vmem:[%s400_s1] sm:$0x1] %v194_v63 }

// kernel: factorized_reduce.2
= control target key start
LH: loop header
LB: loop body
LE: loop exit
PB: predicated region body
PF: predicated region fallthrough
CT: control target
= control target key end

     0   :  { %vm271_vm0 = vcmask 1040384   ;;  %vm273_vm1 = vcmask 1041408   ;;  %vm275_vm2 = vcmask 1042432   ;;  %vm277_vm3 = vcmask 1043456   ;;  %s612_s2 = inlined_call_operand.vmem [shape: f32[128,128], index: 2, kind: input, shape index: {}]   ;;  %s613_s3 = inlined_call_operand.vmem [shape: f32[128,128], index: 3, kind: input, shape index: {}]   ;;  %s614_s0 = inlined_call_operand.vmem [shape: f32[32,128], index: 0, kind: input, shape index: {}]   ;;  %s615_s1 = inlined_call_operand.vmem [shape: f32[32,128], index: 1, kind: input, shape index: {}]   ;;  %s616_s4 = inlined_call_operand.vmem [shape: f32[1,8,128], index: 4, kind: output, shape index: {}]  }
   0x1   :  { %v21_v0 = vld [vmem:[%s612_s2] sm:$0xff]  ;;  %v22_v1 = vld [vmem:[%s612_s2 + $0x8] sm:$0xff]  ;;  %v23_v5 = vld [vmem:[%s612_s2 + $0x10] sm:$0xff] }
   0x2   :  { %v126_v2 = vld [vmem:[%s613_s3] sm:$0xff]  ;;  %v400_v3 = vpack.c.bf16 %v22_v1, %v21_v0  ;;  %v127_v4 = vld [vmem:[%s613_s3 + $0x8] sm:$0xff]  ;;  %v24_v6 = vld [vmem:[%s612_s2 + $0x18] sm:$0xff] }
   0x3   :  { %v432_v7 = vpack.c.bf16 %v127_v4, %v126_v2  ;;  %v404_v8 = vpack.c.bf16 %v24_v6, %v23_v5  ;;  %v128_v9 = vld [vmem:[%s613_s3 + $0x10] sm:$0xff]  ;;  %v129_v10 = vld [vmem:[%s613_s3 + $0x18] sm:$0xff]  ;;  %v25_v11 = vld [vmem:[%s612_s2 + $0x20] sm:$0xff] }
   0x4   :  { %401 = vmatprep.subr.bf16.mxu0 %v400_v3  ;;  %v436_v12 = vpack.c.bf16 %v129_v10, %v128_v9  ;;  %v26_v13 = vld [vmem:[%s612_s2 + $0x28] sm:$0xff]  ;;  %v130_v14 = vld [vmem:[%s613_s3 + $0x20] sm:$0xff]  ;;  %v27_v18 = vld [vmem:[%s612_s2 + $0x30] sm:$0xff] }
   0x5   :  { %v131_v15 = vld [vmem:[%s613_s3 + $0x28] sm:$0xff]  ;;  %433 = vmatprep.subr.bf16.mxu1 %v432_v7  ;;  %403 = vmatpush3.bf16.msra.mxu0 %v400_v3  ;;  %v408_v16 = vpack.c.bf16 %v26_v13, %v25_v11  ;;  %v28_v19 = vld [vmem:[%s612_s2 + $0x38] sm:$0xff]  ;;  %v132_v20 = vld [vmem:[%s613_s3 + $0x30] sm:$0xff] }
   0x6   :  { %435 = vmatpush3.bf16.msra.mxu1 %v432_v7  ;;  %405 = vmatprep.subr.bf16.mxu0 %v404_v8  ;;  %v440_v17 = vpack.c.bf16 %v131_v15, %v130_v14  ;;  %v133_v21 = vld [vmem:[%s613_s3 + $0x38] sm:$0xff]  ;;  %v412_v22 = vpack.c.bf16 %v28_v19, %v27_v18  ;;  %v29_v24 = vld [vmem:[%s612_s2 + $0x40] sm:$0xff]  ;;  %v30_v25 = vld [vmem:[%s612_s2 + $0x48] sm:$0xff] }
   0x7   :  { %437 = vmatprep.subr.bf16.mxu1 %v436_v12  ;;  %v444_v23 = vpack.c.bf16 %v133_v21, %v132_v20  ;;  %v17_v26 = vld [vmem:[%s614_s0] sm:$0xff]  ;;  %v135_v28 = vld [vmem:[%s613_s3 + $0x48] sm:$0xff]  ;;  %v416_v30 = vpack.c.bf16 %v30_v25, %v29_v24  ;;  %v31_v32 = vld [vmem:[%s612_s2 + $0x50] sm:$0xff] }
   0x8   :  { %v134_v27 = vld [vmem:[%s613_s3 + $0x40] sm:$0xff]  ;;  %356 = vmatprep.mubr.f32.mxu0 %v17_v26  ;;  %v32_v33 = vld [vmem:[%s612_s2 + $0x58] sm:$0xff]  ;;  %v136_v34 = vld [vmem:[%s613_s3 + $0x50] sm:$0xff] }
   0x9   :  { %407 = vmatpush3.bf16.msra.mxu0 %v404_v8  ;;  %v122_v29 = vld [vmem:[%s615_s1] sm:$0xff]  ;;  %v448_v31 = vpack.c.bf16 %v135_v28, %v134_v27  ;;  %v137_v35 = vld [vmem:[%s613_s3 + $0x58] sm:$0xff]  ;;  %v420_v36 = vpack.c.bf16 %v32_v33, %v31_v32  ;;  %v34_v39 = vld [vmem:[%s612_s2 + $0x68] sm:$0xff] }
   0xa   :  { %439 = vmatpush3.bf16.msra.mxu1 %v436_v12  ;;  %409 = vmatprep.subr.bf16.mxu0 %v408_v16  ;;  %v452_v37 = vpack.c.bf16 %v137_v35, %v136_v34  ;;  %v33_v38 = vld [vmem:[%s612_s2 + $0x60] sm:$0xff]  ;;  %v139_v41 = vld [vmem:[%s613_s3 + $0x68] sm:$0xff]  ;;  %v35_v44 = vld [vmem:[%s612_s2 + $0x70] sm:$0xff] }
   0xb   :  { %441 = vmatprep.subr.bf16.mxu1 %v440_v17  ;;  %394 = vmatprep.mubr.f32.mxu1 %v122_v29  ;;  %v138_v40 = vld [vmem:[%s613_s3 + $0x60] sm:$0xff]  ;;  %v424_v42 = vpack.c.bf16 %v34_v39, %v33_v38  ;;  %v36_v45 = vld [vmem:[%s612_s2 + $0x78] sm:$0xff]  ;;  %v140_v46 = vld [vmem:[%s613_s3 + $0x70] sm:$0xff] }
   0xc   :  { %v456_v43 = vpack.c.bf16 %v139_v41, %v138_v40  ;;  %v141_v47 = vld [vmem:[%s613_s3 + $0x78] sm:$0xff]  ;;  %v428_v48 = vpack.c.bf16 %v36_v45, %v35_v44  ;;  %v18_v50 = vld [vmem:[%s614_s0 + $0x8] sm:$0xff]  ;;  %v19_v52 = vld [vmem:[%s614_s0 + $0x10] sm:$0xff] }
   0xd   :  { %411 = vmatpush3.bf16.msra.mxu0 %v408_v16  ;;  %v460_v49 = vpack.c.bf16 %v141_v47, %v140_v46  ;;  %v123_v51 = vld [vmem:[%s615_s1 + $0x8] sm:$0xff]  ;;  %v124_v53 = vld [vmem:[%s615_s1 + $0x10] sm:$0xff]  ;;  %v20_v54 = vld [vmem:[%s614_s0 + $0x18] sm:$0xff] }
   0xe   :  { %443 = vmatpush3.bf16.msra.mxu1 %v440_v17  ;;  %413 = vmatprep.subr.bf16.mxu0 %v412_v22  ;;  %v125_v55 = vld [vmem:[%s615_s1 + $0x18] sm:$0xff] }
   0xf   :  { %445 = vmatprep.subr.bf16.mxu1 %v444_v23 }
  0x11   :  { %415 = vmatpush3.bf16.msra.mxu0 %v412_v22 }
  0x12   :  { %447 = vmatpush3.bf16.msra.mxu1 %v444_v23  ;;  %417 = vmatprep.subr.bf16.mxu0 %v416_v30 }
  0x13   :  { %449 = vmatprep.subr.bf16.mxu1 %v448_v31 }
  0x15   :  { %419 = vmatpush3.bf16.msra.mxu0 %v416_v30 }
  0x16   :  { %451 = vmatpush3.bf16.msra.mxu1 %v448_v31  ;;  %421 = vmatprep.subr.bf16.mxu0 %v420_v36 }
  0x17   :  { %453 = vmatprep.subr.bf16.mxu1 %v452_v37 }
  0x19   :  { %423 = vmatpush3.bf16.msra.mxu0 %v420_v36 }
  0x1a   :  { %455 = vmatpush3.bf16.msra.mxu1 %v452_v37  ;;  %425 = vmatprep.subr.bf16.mxu0 %v424_v42 }
  0x1b   :  { %457 = vmatprep.subr.bf16.mxu1 %v456_v43 }
  0x1d   :  { %427 = vmatpush3.bf16.msra.mxu0 %v424_v42 }
  0x1e   :  { %459 = vmatpush3.bf16.msra.mxu1 %v456_v43  ;;  %429 = vmatprep.subr.bf16.mxu0 %v428_v48 }
  0x1f   :  { %461 = vmatprep.subr.bf16.mxu1 %v460_v49 }
  0x21   :  { %431 = vmatpush3.bf16.msra.mxu0 %v428_v48 }
  0x22   :  { %463 = vmatpush3.bf16.msra.mxu1 %v460_v49 }
  0x24   :  { %357 = vmatmul.mubr.f32.vlgmr.msra.gmra.mrb[0].mxu0 %v18_v50 }
  0x25   :  { %395 = vmatmul.mubr.f32.vlgmr.msra.gmra.mrb[0].mxu1 %v123_v51  ;;  %359 = vmatprep.mubr.f32.mxu0 %v19_v52 }
  0x26   :  { %397 = vmatprep.mubr.f32.mxu1 %v124_v53 }
  0x28   :  { %360 = vmatmul.mubr.f32.gmra.mrb[2].mxu0 %v20_v54 }
  0x29   :  { %398 = vmatmul.mubr.f32.gmra.mrb[2].mxu1 %v125_v55 }
  0xf7   :  { %v358_v56 = vpop.f32.mrb[0].mxu0 }
  0xf8   :  { %v237_v57 = vmul.f32 %v358_v56, %v358_v56  ;;  %v103_v58 = vpop.f32.mrb[1].mxu0  ;;  %v396_v59 = vpop.f32.mrb[0].mxu1 }
  0xf9   :  { %v227_v60 = vadd.f32 %v358_v56, %v103_v58  ;;  %v236_v61 = vmul.f32 %v103_v58, %v103_v58  ;;  %v259_v62 = vmul.f32 %v396_v59, %v396_v59  ;;  %v208_v63 = vpop.f32.mrb[1].mxu1 }
  0xfa   :  { %v249_v0 = vadd.f32 %v396_v59, %v208_v63  ;;  %v258_v1 = vmul.f32 %v208_v63, %v208_v63 }
  0xfb   :  { %v240_v2 = vadd.f32 %v237_v57, %v236_v61  ;;  %v361_v3 = vpop.f32.mrb[2].mxu0 }
  0xfc   :  { %v262_v4 = vadd.f32 %v259_v62, %v258_v1  ;;  %v399_v5 = vpop.f32.mrb[2].mxu1  ;;  %v113_v6 = vpop.f32.mrb[3].mxu0  ;;  %v239_v13 = vmul.f32 %v361_v3, %v361_v3 }
  0xfd   :  { %v228_v7 = vadd.f32 %v227_v60, %v113_v6  ;;  %v238_v8 = vmul.f32 %v113_v6, %v113_v6  ;;  %v218_v9 = vpop.f32.mrb[3].mxu1  ;;  %v261_v10 = vmul.f32 %v399_v5, %v399_v5 }
  0xfe   :  { %v250_v11 = vadd.f32 %v249_v0, %v218_v9  ;;  %v260_v12 = vmul.f32 %v218_v9, %v218_v9 }
  0xff   :  { %v229_v14 = vadd.f32 %v361_v3, %v228_v7  ;;  %v241_v15 = vadd.f32 %v240_v2, %v238_v8 }
 0x100   :  { %v251_v16 = vadd.f32 %v399_v5, %v250_v11  ;;  %v263_v17 = vadd.f32 %v262_v4, %v260_v12 }
 0x101   :  { %v230_v18 = vrot.slane %v229_v14, 4  ;;  %v242_v19 = vadd.f32 %v241_v15, %v239_v13 }
 0x102   :  { %v252_v20 = vrot.slane %v251_v16, 4  ;;  %v264_v21 = vadd.f32 %v263_v17, %v261_v10 }
 0x103   :  { %v231_v22 = vadd.f32 %v230_v18, %v229_v14  ;;  %v243_v23 = vrot.slane %v242_v19, 4 }
 0x104   :  { %v253_v24 = vadd.f32 %v252_v20, %v251_v16  ;;  %v265_v25 = vrot.slane %v264_v21, 4 }
 0x105   :  { %v232_v26 = vrot.slane %v231_v22, 2  ;;  %v244_v27 = vadd.f32 %v243_v23, %v242_v19 }
 0x106   :  { %v254_v28 = vrot.slane %v253_v24, 2  ;;  %v266_v29 = vadd.f32 %v265_v25, %v264_v21 }
 0x107   :  { %v233_v30 = vadd.f32 %v232_v26, %v231_v22  ;;  %v245_v31 = vrot.slane %v244_v27, 2 }
 0x108   :  { %v255_v32 = vadd.f32 %v254_v28, %v253_v24  ;;  %v267_v33 = vrot.slane %v266_v29, 2 }
 0x109   :  { %v234_v34 = vrot.slane %v233_v30, 1  ;;  %v246_v35 = vadd.f32 %v245_v31, %v244_v27 }
 0x10a   :  { %v256_v36 = vrot.slane %v255_v32, 1  ;;  %v268_v37 = vadd.f32 %v267_v33, %v266_v29 }
 0x10b   :  { %v247_v38 = vrot.slane %v246_v35, 1  ;;  %v235_v40 = vadd.f32 %v234_v34, %v233_v30 }
 0x10c   :  { %v269_v39 = vrot.slane %v268_v37, 1  ;;  %v257_v42 = vadd.f32 %v256_v36, %v255_v32 }
 0x10d   :  { %v248_v41 = vadd.f32 %v247_v38, %v246_v35 }
 0x10e   :  { %v270_v44 = vadd.f32 %v269_v39, %v268_v37 }
 0x10f   :  { %v272_v43 = vsel %vm271_vm0, %v235_v40, %v248_v41 }
 0x110   :  { %v274_v45 = vsel %vm273_vm1, %v272_v43, %v257_v42 }
 0x111   :  { %v276_v46 = vsel %vm275_vm2, %v274_v45, %v270_v44 }
 0x112   :  { %v278_v47 = vsel %vm277_vm3, %v276_v46, 0.0 }
 0x113   :  { %279 = vst [vmem:[%s616_s4] sm:$0xff] %v278_v47 }

// kernel: factorized_reduce.3
= control target key start
LH: loop header
LB: loop body
LE: loop exit
PB: predicated region body
PF: predicated region fallthrough
CT: control target
= control target key end

     0   :  { %s645_s2 = inlined_call_operand.vmem [shape: f32[128,128], index: 2, kind: input, shape index: {}]   ;;  %s646_s3 = inlined_call_operand.vmem [shape: f32[128,128], index: 3, kind: input, shape index: {}]   ;;  %s647_s0 = inlined_call_operand.vmem [shape: f32[32,128], index: 0, kind: input, shape index: {}]   ;;  %s648_s1 = inlined_call_operand.vmem [shape: f32[32,128], index: 1, kind: input, shape index: {}]   ;;  %s649_s4 = inlined_call_operand.vmem [shape: f32[1,128], index: 4, kind: input, shape index: {}]   ;;  %s650_s5 = inlined_call_operand.vmem [shape: f32[1,128], index: 5, kind: input, shape index: {}]   ;;  %s651_s6 = inlined_call_operand.vmem [shape: f32[32,128], index: 6, kind: output, shape index: {0}]   ;;  %s652_s7 = inlined_call_operand.vmem [shape: f32[32,128], index: 7, kind: output, shape index: {1}]  }
   0x1   :  { %v29_v0 = vld [vmem:[%s645_s2] sm:$0xff]  ;;  %v30_v1 = vld [vmem:[%s645_s2 + $0x8] sm:$0xff]  ;;  %v31_v5 = vld [vmem:[%s645_s2 + $0x10] sm:$0xff] }
   0x2   :  { %v149_v2 = vld [vmem:[%s646_s3] sm:$0xff]  ;;  %v391_v3 = vpack.c.bf16 %v30_v1, %v29_v0  ;;  %v150_v4 = vld [vmem:[%s646_s3 + $0x8] sm:$0xff]  ;;  %v32_v6 = vld [vmem:[%s645_s2 + $0x18] sm:$0xff] }
   0x3   :  { %v423_v7 = vpack.c.bf16 %v150_v4, %v149_v2  ;;  %v395_v8 = vpack.c.bf16 %v32_v6, %v31_v5  ;;  %v151_v9 = vld [vmem:[%s646_s3 + $0x10] sm:$0xff]  ;;  %v152_v10 = vld [vmem:[%s646_s3 + $0x18] sm:$0xff]  ;;  %v33_v11 = vld [vmem:[%s645_s2 + $0x20] sm:$0xff] }
   0x4   :  { %392 = vmatprep.subr.bf16.mxu0 %v391_v3  ;;  %v427_v12 = vpack.c.bf16 %v152_v10, %v151_v9  ;;  %v34_v13 = vld [vmem:[%s645_s2 + $0x28] sm:$0xff]  ;;  %v153_v14 = vld [vmem:[%s646_s3 + $0x20] sm:$0xff]  ;;  %v35_v18 = vld [vmem:[%s645_s2 + $0x30] sm:$0xff] }
   0x5   :  { %v154_v15 = vld [vmem:[%s646_s3 + $0x28] sm:$0xff]  ;;  %424 = vmatprep.subr.bf16.mxu1 %v423_v7  ;;  %394 = vmatpush3.bf16.msra.mxu0 %v391_v3  ;;  %v399_v16 = vpack.c.bf16 %v34_v13, %v33_v11  ;;  %v36_v19 = vld [vmem:[%s645_s2 + $0x38] sm:$0xff]  ;;  %v155_v20 = vld [vmem:[%s646_s3 + $0x30] sm:$0xff] }
   0x6   :  { %426 = vmatpush3.bf16.msra.mxu1 %v423_v7  ;;  %396 = vmatprep.subr.bf16.mxu0 %v395_v8  ;;  %v431_v17 = vpack.c.bf16 %v154_v15, %v153_v14  ;;  %v156_v21 = vld [vmem:[%s646_s3 + $0x38] sm:$0xff]  ;;  %v403_v22 = vpack.c.bf16 %v36_v19, %v35_v18  ;;  %v37_v24 = vld [vmem:[%s645_s2 + $0x40] sm:$0xff]  ;;  %v38_v25 = vld [vmem:[%s645_s2 + $0x48] sm:$0xff] }
   0x7   :  { %428 = vmatprep.subr.bf16.mxu1 %v427_v12  ;;  %v435_v23 = vpack.c.bf16 %v156_v21, %v155_v20  ;;  %v25_v26 = vld [vmem:[%s647_s0] sm:$0xff]  ;;  %v158_v28 = vld [vmem:[%s646_s3 + $0x48] sm:$0xff]  ;;  %v407_v30 = vpack.c.bf16 %v38_v25, %v37_v24  ;;  %v39_v32 = vld [vmem:[%s645_s2 + $0x50] sm:$0xff] }
   0x8   :  { %v157_v27 = vld [vmem:[%s646_s3 + $0x40] sm:$0xff]  ;;  %347 = vmatprep.mubr.f32.mxu0 %v25_v26  ;;  %v40_v33 = vld [vmem:[%s645_s2 + $0x58] sm:$0xff]  ;;  %v159_v34 = vld [vmem:[%s646_s3 + $0x50] sm:$0xff] }
   0x9   :  { %398 = vmatpush3.bf16.msra.mxu0 %v395_v8  ;;  %v145_v29 = vld [vmem:[%s648_s1] sm:$0xff]  ;;  %v439_v31 = vpack.c.bf16 %v158_v28, %v157_v27  ;;  %v160_v35 = vld [vmem:[%s646_s3 + $0x58] sm:$0xff]  ;;  %v411_v36 = vpack.c.bf16 %v40_v33, %v39_v32  ;;  %v42_v39 = vld [vmem:[%s645_s2 + $0x68] sm:$0xff] }
   0xa   :  { %430 = vmatpush3.bf16.msra.mxu1 %v427_v12  ;;  %400 = vmatprep.subr.bf16.mxu0 %v399_v16  ;;  %v443_v37 = vpack.c.bf16 %v160_v35, %v159_v34  ;;  %v41_v38 = vld [vmem:[%s645_s2 + $0x60] sm:$0xff]  ;;  %v162_v41 = vld [vmem:[%s646_s3 + $0x68] sm:$0xff]  ;;  %v43_v44 = vld [vmem:[%s645_s2 + $0x70] sm:$0xff] }
   0xb   :  { %432 = vmatprep.subr.bf16.mxu1 %v431_v17  ;;  %385 = vmatprep.mubr.f32.mxu1 %v145_v29  ;;  %v161_v40 = vld [vmem:[%s646_s3 + $0x60] sm:$0xff]  ;;  %v415_v42 = vpack.c.bf16 %v42_v39, %v41_v38  ;;  %v44_v45 = vld [vmem:[%s645_s2 + $0x78] sm:$0xff]  ;;  %v163_v46 = vld [vmem:[%s646_s3 + $0x70] sm:$0xff] }
   0xc   :  { %v447_v43 = vpack.c.bf16 %v162_v41, %v161_v40  ;;  %v164_v47 = vld [vmem:[%s646_s3 + $0x78] sm:$0xff]  ;;  %v419_v48 = vpack.c.bf16 %v44_v45, %v43_v44  ;;  %v26_v50 = vld [vmem:[%s647_s0 + $0x8] sm:$0xff]  ;;  %v27_v52 = vld [vmem:[%s647_s0 + $0x10] sm:$0xff] }
   0xd   :  { %402 = vmatpush3.bf16.msra.mxu0 %v399_v16  ;;  %v451_v49 = vpack.c.bf16 %v164_v47, %v163_v46  ;;  %v146_v51 = vld [vmem:[%s648_s1 + $0x8] sm:$0xff]  ;;  %v147_v53 = vld [vmem:[%s648_s1 + $0x10] sm:$0xff]  ;;  %v28_v54 = vld [vmem:[%s647_s0 + $0x18] sm:$0xff] }
   0xe   :  { %434 = vmatpush3.bf16.msra.mxu1 %v431_v17  ;;  %404 = vmatprep.subr.bf16.mxu0 %v403_v22  ;;  %v148_v55 = vld [vmem:[%s648_s1 + $0x18] sm:$0xff]  ;;  %v273_v56 = vld [vmem:[%s649_s4] ss:$0 sm:$0xff] }
   0xf   :  { %436 = vmatprep.subr.bf16.mxu1 %v435_v23  ;;  %v274_v57 = vld [vmem:[%s650_s5] ss:$0 sm:$0xff] }
  0x11   :  { %406 = vmatpush3.bf16.msra.mxu0 %v403_v22 }
  0x12   :  { %438 = vmatpush3.bf16.msra.mxu1 %v435_v23  ;;  %408 = vmatprep.subr.bf16.mxu0 %v407_v30 }
  0x13   :  { %440 = vmatprep.subr.bf16.mxu1 %v439_v31 }
  0x15   :  { %410 = vmatpush3.bf16.msra.mxu0 %v407_v30 }
  0x16   :  { %442 = vmatpush3.bf16.msra.mxu1 %v439_v31  ;;  %412 = vmatprep.subr.bf16.mxu0 %v411_v36 }
  0x17   :  { %444 = vmatprep.subr.bf16.mxu1 %v443_v37 }
  0x19   :  { %414 = vmatpush3.bf16.msra.mxu0 %v411_v36 }
  0x1a   :  { %446 = vmatpush3.bf16.msra.mxu1 %v443_v37  ;;  %416 = vmatprep.subr.bf16.mxu0 %v415_v42 }
  0x1b   :  { %448 = vmatprep.subr.bf16.mxu1 %v447_v43 }
  0x1d   :  { %418 = vmatpush3.bf16.msra.mxu0 %v415_v42 }
  0x1e   :  { %450 = vmatpush3.bf16.msra.mxu1 %v447_v43  ;;  %420 = vmatprep.subr.bf16.mxu0 %v419_v48 }
  0x1f   :  { %452 = vmatprep.subr.bf16.mxu1 %v451_v49 }
  0x21   :  { %422 = vmatpush3.bf16.msra.mxu0 %v419_v48 }
  0x22   :  { %454 = vmatpush3.bf16.msra.mxu1 %v451_v49 }
  0x24   :  { %348 = vmatmul.mubr.f32.vlgmr.msra.gmra.mrb[0].mxu0 %v26_v50 }
  0x25   :  { %386 = vmatmul.mubr.f32.vlgmr.msra.gmra.mrb[0].mxu1 %v146_v51  ;;  %350 = vmatprep.mubr.f32.mxu0 %v27_v52 }
  0x26   :  { %388 = vmatprep.mubr.f32.mxu1 %v147_v53 }
  0x28   :  { %351 = vmatmul.mubr.f32.gmra.mrb[2].mxu0 %v28_v54 }
  0x29   :  { %389 = vmatmul.mubr.f32.gmra.mrb[2].mxu1 %v148_v55 }
  0xf7   :  { %v349_v58 = vpop.f32.mrb[0].mxu0 }
  0xf8   :  { %v124_v59 = vadd.f32 %v349_v58, %v273_v56  ;;  %v387_v60 = vpop.f32.mrb[0].mxu1  ;;  %v118_v61 = vpop.f32.mrb[1].mxu0 }
  0xf9   :  { %v244_v62 = vadd.f32 %v387_v60, %v274_v57  ;;  %v119_v63 = vadd.f32 %v273_v56, %v118_v61  ;;  %v238_v0 = vpop.f32.mrb[1].mxu1 }
  0xfa   :  { %v138_v1 = vmax.f32 %v124_v59, 0.0  ;;  %v239_v2 = vadd.f32 %v274_v57, %v238_v0 }
  0xfb   :  { %v258_v3 = vmax.f32 %v244_v62, 0.0  ;;  %v137_v4 = vmax.f32 %v119_v63, 0.0  ;;  %v352_v5 = vpop.f32.mrb[2].mxu0 }
  0xfc   :  { %142 = vst [vmem:[%s651_s6 + $0x8] sm:$0xff] %v138_v1  ;;  %v257_v6 = vmax.f32 %v239_v2, 0.0  ;;  %v134_v7 = vadd.f32 %v352_v5, %v273_v56  ;;  %v390_v8 = vpop.f32.mrb[2].mxu1  ;;  %v128_v9 = vpop.f32.mrb[3].mxu0 }
  0xfd   :  { %262 = vst [vmem:[%s652_s7 + $0x8] sm:$0xff] %v258_v3  ;;  %141 = vst [vmem:[%s651_s6] sm:$0xff] %v137_v4  ;;  %v254_v10 = vadd.f32 %v390_v8, %v274_v57  ;;  %v129_v11 = vadd.f32 %v273_v56, %v128_v9  ;;  %v248_v12 = vpop.f32.mrb[3].mxu1 }
  0xfe   :  { %261 = vst [vmem:[%s652_s7] sm:$0xff] %v257_v6  ;;  %v140_v13 = vmax.f32 %v134_v7, 0.0  ;;  %v249_v14 = vadd.f32 %v274_v57, %v248_v12 }
  0xff   :  { %v260_v15 = vmax.f32 %v254_v10, 0.0  ;;  %v139_v16 = vmax.f32 %v129_v11, 0.0 }
 0x100   :  { %144 = vst [vmem:[%s651_s6 + $0x18] sm:$0xff] %v140_v13  ;;  %v259_v17 = vmax.f32 %v249_v14, 0.0 }
 0x101   :  { %264 = vst [vmem:[%s652_s7 + $0x18] sm:$0xff] %v260_v15  ;;  %143 = vst [vmem:[%s651_s6 + $0x10] sm:$0xff] %v139_v16 }
 0x102   :  { %263 = vst [vmem:[%s652_s7 + $0x10] sm:$0xff] %v259_v17 }

</bundles_post_ra>
